<compile_context>
chip_gen: v5e
topology: v5e:2x2
jax: 0.10.0
libtpu: 0.0.40
codegen_flags: <defaults>
</compile_context>

<pallas_src>
import numpy as np
import jax
import jax.numpy as jnp
from jax.experimental import pallas as pl
from jax.experimental.pallas import tpu as pltpu


# ----------------------------------------------------------------------------
# Per-generation defaults and static tiling choices (host-side, trace time)
# ----------------------------------------------------------------------------
def _device_defaults():
    """(preferred feat_tile, VMEM budget cap) per TPU generation."""
    kind = ""
    try:
        kind = jax.devices()[0].device_kind.lower()
    except Exception:            # no device visible at trace time
        pass
    if "v5" in kind or "v6" in kind:
        return 512, 96 * (1 << 20)     # 128 MiB VMEM chips: big lane-dense tiles
    return 256, 40 * (1 << 20)         # v7x (64 MiB VMEM) / unknown: conservative


def _round_up(x, m):
    return -(-x // m) * m


def _choose_feat_tile(n_features, preferred):
    """Lane-dense feature tile (multiple of 128), never padding more than
    needed, and keeping >=2 tiles when possible so the 'parallel' feature
    axis can shard across the two TensorCores on v7x."""
    tile = min(preferred, _round_up(n_features, 128))
    while tile > 128 and -(-n_features // tile) < 2:
        tile //= 2
    return tile


def _choose_p_chunk(pshape, target_k):
    """Chunk size c0 along the FIRST parameter dim.  The flattened chunk
    (c0 * prod(pshape[1:])) must be a 128-multiple (lane-aligned gradient
    blocks) and c0 a multiple of 8 (sublane-aligned transform blocks), unless
    we fall back to a single chunk (c0 == pshape[0])."""
    p0 = int(pshape[0])
    rest = int(np.prod(pshape[1:], dtype=np.int64)) if len(pshape) > 1 else 1
    if p0 * rest <= target_k:
        return p0
    best = None
    for c0 in range(1, p0):
        if p0 % c0 or c0 % 8:
            continue
        k = c0 * rest
        if k % 128 or k > target_k:
            continue
        best = c0 if best is None else max(best, c0)
    return best if best is not None else p0


# ----------------------------------------------------------------------------
# Pallas kernel (one parameter tensor, grid = (feature tiles, p chunks))
# ----------------------------------------------------------------------------
def _make_name_kernel(ranks, pshape, c0, feat_tile, matmul_dtype):
    ndims = len(ranks)
    pdims = (c0,) + tuple(pshape[1:])
    k_chunk = int(np.prod(pdims, dtype=np.int64))

    def kernel(*refs):
        core_ref = refs[0]                       # (*ranks, feat_tile) f32
        t_refs = refs[1:1 + ndims]               # d=0: (r0, c0, ft); d>0: (rd, pd, ft)
        g_ref = refs[1 + ndims]                  # (B, k_chunk) f32 (streamed chunk)
        out_ref = refs[2 + ndims]                # (B, feat_tile) f32 (resident acc)
        j = pl.program_id(1)                     # p-chunk (reduction) index

        # Tucker mode products on the VPU; the feature axis stays lane-dense
        # throughout.  Slice-accumulate over each rank dim so the peak
        # intermediate is r_d x smaller than broadcast-multiply + sum.
        w = core_ref[...]
        for d in range(ndims):
            pd = pdims[d]
            t_shape = (1,) * d + (pd,) + (1,) * (ndims - 1 - d) + (feat_tile,)
            acc = None
            for rr in range(ranks[d]):
                w_r = jax.lax.slice_in_dim(w, rr, rr + 1, axis=d)   # keep dim=1
                t_r = t_refs[d][rr].reshape(t_shape)                # (pd, ft) bcast
                term = w_r * t_r
                acc = term if acc is None else acc + term
            w = acc                                                  # rank d contracted

        # w: (c0, p1, .., p_{D-1}, ft) -> (k_chunk, ft).  Leading-dim flatten
        # only (lane dim preserved); free view when p_{D-1} % 8 == 0.
        # TODO(synk): keep multi-dim contracting dims (or 8-pad p_{D-1}) for
        # parameter shapes whose last dim is not a multiple of 8.
        w_flat = w.reshape(k_chunk, feat_tile).astype(matmul_dtype)
        g = g_ref[...].astype(matmul_dtype)       # f32 -> bf16 in-kernel (VPU)

        # Single MXU matmul per grid step: bf16 inputs, f32 accumulation,
        # lane-dense (B, feat_tile) result.
        contrib = jax.lax.dot_general(
            g, w_flat, dimension_numbers=(((1,), (0,)), ((), ())),
            preferred_element_type=jnp.float32)

        # Output block is resident across the reduction axis: write on the
        # first chunk, accumulate afterwards (no separate zero-init store).
        @pl.when(j == 0)
        def _():
            out_ref[...] = contrib

        @pl.when(j > 0)
        def _():
            out_ref[...] += contrib

    return kernel


# ----------------------------------------------------------------------------
# Advisory cost / VMEM bookkeeping (host-side)
# ----------------------------------------------------------------------------
def _vmem_estimate(ranks, pshape, c0, feat_tile, batch):
    nd = len(ranks)
    pdims = (c0,) + tuple(pshape[1:])
    k_chunk = int(np.prod(pdims, dtype=np.int64))
    factor_tile = int(np.prod(ranks, dtype=np.int64)) * feat_tile * 4
    factor_tile += ranks[0] * c0 * feat_tile * 4
    for d in range(1, nd):
        factor_tile += ranks[d] * pshape[d] * feat_tile * 4
    grad_blk = batch * k_chunk * 4
    out_blk = batch * feat_tile * 4
    inter, prev = 0, int(np.prod(ranks, dtype=np.int64)) * feat_tile
    suf, pref = int(np.prod(ranks, dtype=np.int64)), 1
    for d in range(nd):
        suf //= ranks[d]
        cur = pref * pdims[d] * suf * feat_tile
        inter = max(inter, prev + cur)
        prev = cur
        pref *= pdims[d]
    inter_bytes = inter * 4 + k_chunk * feat_tile * 2 + batch * k_chunk * 2
    return 2 * (factor_tile + grad_blk + out_blk) + inter_bytes


def _cost_estimate(ranks, pshape, c0, feat_tile, n_tiles, batch):
    nd = len(ranks)
    pdims = (c0,) + tuple(pshape[1:])
    k_chunk = int(np.prod(pdims, dtype=np.int64))
    n_chunks = pshape[0] // c0
    feat_pad = n_tiles * feat_tile
    p_total = int(np.prod(pshape, dtype=np.int64))
    flops_step = 0
    suf, pref = int(np.prod(ranks, dtype=np.int64)), 1
    for d in range(nd):
        suf //= ranks[d]
        flops_step += 2 * ranks[d] * pref * pdims[d] * suf * feat_tile
        pref *= pdims[d]
    flops_step += 2 * batch * k_chunk * feat_tile
    factor_bytes = (int(np.prod(ranks, dtype=np.int64))
                    + sum(ranks[d] * pshape[d] for d in range(nd))) * feat_pad * 4
    grad_reads = n_tiles if n_chunks > 1 else 1
    bytes_accessed = (factor_bytes + batch * p_total * 4 * grad_reads
                      + batch * feat_pad * 4)
    return pl.CostEstimate(flops=int(flops_step * n_tiles * n_chunks),
                           transcendentals=0,
                           bytes_accessed=int(bytes_accessed))


# ----------------------------------------------------------------------------
# Prepare (one-time): pad factor feature axis, pick tiles / chunk sizes
# ----------------------------------------------------------------------------
def prepare_eigenmodel(low_rank_encode, n_features, *, feat_tile=None,
                       p_chunk_target=4096, matmul_dtype=jnp.bfloat16,
                       vmem_cap=None):
    pref_tile, pref_cap = _device_defaults()
    if feat_tile is None:
        feat_tile = _choose_feat_tile(n_features, pref_tile)
    if vmem_cap is None:
        vmem_cap = pref_cap
    n_tiles = -(-n_features // feat_tile)
    feat_pad = n_tiles * feat_tile
    pad_f = feat_pad - n_features

    names = {}
    for name, d in low_rank_encode.items():
        core = jnp.asarray(d['core_tensor'], jnp.float32)
        transforms = [jnp.asarray(t, jnp.float32)
                      for t in d['transform_tensors']]
        ranks = tuple(int(s) for s in core.shape[:-1])
        pshape = tuple(int(t.shape[1]) for t in transforms)
        # Pre-pad the (static) factor tensors ONCE; padded feature columns
        # contribute exact zeros and are sliced off after the kernel.
        if pad_f:
            core = jnp.pad(core, [(0, 0)] * len(ranks) + [(0, pad_f)])
            transforms = [jnp.pad(t, [(0, 0), (0, 0), (0, pad_f)])
                          for t in transforms]
        c0 = _choose_p_chunk(pshape, p_chunk_target)
        names[name] = dict(core=core, transforms=transforms,
                           ranks=ranks, pshape=pshape, c0=c0)

    return dict(n_features=n_features, feat_tile=feat_tile, feat_pad=feat_pad,
                matmul_dtype=matmul_dtype, vmem_cap=int(vmem_cap), names=names)


# ----------------------------------------------------------------------------
# Forward
# ----------------------------------------------------------------------------
def _forward_one_name(entry, grad, batch, feat_tile, feat_pad, matmul_dtype,
                      vmem_cap):
    ranks, pshape, c0 = entry['ranks'], entry['pshape'], entry['c0']
    ndims = len(ranks)
    rest = int(np.prod(pshape[1:], dtype=np.int64)) if ndims > 1 else 1
    p_total = int(np.prod(pshape, dtype=np.int64))
    k_chunk = c0 * rest
    n_tiles = feat_pad // feat_tile
    n_chunks = pshape[0] // c0

    # Free XLA-level flatten; gradients stay in their native f32.
    g_flat = grad.reshape(batch, p_total)

    in_specs = [
        # core: depends only on the feature tile -> fetched once per tile.
        pl.BlockSpec(tuple(ranks) + (feat_tile,),
                     lambda i, j, nd=ndims: (0,) * nd + (i,)),
        # first transform: streamed in sync with the gradient p-chunk.
        pl.BlockSpec((ranks[0], c0, feat_tile), lambda i, j: (0, j, i)),
    ]
    for d in range(1, ndims):
        in_specs.append(pl.BlockSpec((ranks[d], pshape[d], feat_tile),
                                     lambda i, j: (0, 0, i)))
    # gradient chunk: (B, k_chunk), streamed along the reduction axis.
    in_specs.append(pl.BlockSpec((batch, k_chunk), lambda i, j: (0, j)))

    vmem_limit = int(min(max(2 * _vmem_estimate(ranks, pshape, c0, feat_tile,
                                                batch), 16 << 20), vmem_cap))
    kernel = _make_name_kernel(ranks, pshape, c0, feat_tile, matmul_dtype)
    cost = _cost_estimate(ranks, pshape, c0, feat_tile, n_tiles, batch)

    # TODO(synk): if gradient HBM re-reads (x n_tiles) ever dominate, flip to
    # a chunk-outer grid with a full (B, feat_pad) f32 VMEM scratch
    # accumulator (the output is tiny) so gradients are read exactly once.
    return pl.pallas_call(
        kernel,
        out_shape=jax.ShapeDtypeStruct((batch, feat_pad), jnp.float32),
        grid=(n_tiles, n_chunks),                       # reduction axis last
        in_specs=in_specs,
        out_specs=pl.BlockSpec((batch, feat_tile), lambda i, j: (0, i)),
        compiler_params=pltpu.CompilerParams(
            # TODO(synk): verify the feature axis shards across both v7x
            # TensorCores; try pltpu.CORE_PARALLEL if "parallel" does not.
            dimension_semantics=("parallel", "arbitrary"),
            vmem_limit_bytes=vmem_limit),
        cost_estimate=cost,
    )(entry['core'], *entry['transforms'], g_flat)


def eigenmodel_forward(prepared, gradients):
    """prepared: output of prepare_eigenmodel; gradients: dict name ->
    (B, *param_shape) float32.  Returns (B, n_features) float32."""
    names = prepared['names']
    first = next(iter(names))
    batch = int(gradients[first].shape[0])
    out = None
    for name, entry in names.items():
        partial = _forward_one_name(entry, gradients[name], batch,
                                    prepared['feat_tile'],
                                    prepared['feat_pad'],
                                    prepared['matmul_dtype'],
                                    prepared['vmem_cap'])
        out = partial if out is None else out + partial
    nf = prepared['n_features']
    return out[:, :nf] if nf != prepared['feat_pad'] else out


# ----------------------------------------------------------------------------
# Plain-JAX glue reproducing __init__ (synthetic factor weights +
# normalize_low_ranks) and a pure-JAX reference forward for validation.
# These are host-side setup in the original module, not kernel work.
# ----------------------------------------------------------------------------
def _construct_subnetworks(decode):
    nets = {}
    for name, d in decode.items():
        w = jnp.moveaxis(d['core_tensor'], -1, 0)        # (F, *ranks)
        for t in d['transform_tensors']:
            tf = jnp.moveaxis(t, -1, 0)                  # (F, r_d, p_d)
            w = jax.lax.dot_general(
                w, tf, dimension_numbers=(((1,), (1,)), ((0,), (0,))))
        nets[name] = jnp.moveaxis(w, 0, -1)              # (*pshape, F)
    return nets


def init_eigenmodel(param_shapes, rank_dict, n_features, key, eps=1e-10):
    decode = {}
    for name, pshape in param_shapes.items():
        ranks = rank_dict[name]
        key, k = jax.random.split(key)
        core = jax.random.normal(
            k, tuple(ranks) + (n_features,), jnp.float32) / n_features
        transforms = []
        for d in range(len(ranks)):
            key, k = jax.random.split(key)
            transforms.append(
                jax.random.normal(
                    k, (ranks[d], pshape[d], n_features), jnp.float32)
                / n_features)
        decode[name] = {'core_tensor': core, 'transform_tensors': transforms}

    # normalize_low_ranks: per-feature norm over all parameter subnetworks
    nets = _construct_subnetworks(decode)
    per_name = [jnp.sqrt(jnp.sum(nets[n] ** 2,
                                 axis=tuple(range(nets[n].ndim - 1))))
                for n in nets]                            # each (F,)
    norms = jnp.sqrt(sum(per_name))                       # (F,)

    encode = {}
    for name in decode:
        n_adapt = len(decode[name]['transform_tensors']) + 1
        scale = norms ** (1.0 / n_adapt) + eps            # (F,)
        encode[name] = {
            'core_tensor': decode[name]['core_tensor'] / scale,
            'transform_tensors': [t / scale
                                  for t in decode[name]['transform_tensors']],
        }
    return encode


def ref_forward(encode, grads):
    jvp = None
    for name, d in encode.items():
        core, transforms, g = (d['core_tensor'], d['transform_tensors'],
                               grads[name])
        ndims = len(transforms)
        rl, pidx = 'abcd'[:ndims], 'mnop'[:ndims]
        pattern = (rl + 'z,'
                   + ','.join(rl[i] + pidx[i] + 'z' for i in range(ndims))
                   + ',...' + pidx + '->...z')
        contrib = jnp.einsum(pattern, core, *transforms, g)
        jvp = contrib if jvp is None else jvp + contrib
    return jvp


# ----------------------------------------------------------------------------
if __name__ == "__main__":
    key = jax.random.PRNGKey(0)
    n_features = 16
    batch = 2

    # synthetic "model" parameters (two weight matrices + one bias vector)
    param_shapes = {"fc1.weight": (16, 32), "fc2.weight": (8, 16),
                    "fc2.bias": (8,)}
    rank_dict = {"fc1.weight": (4, 8), "fc2.weight": (4, 4),
                 "fc2.bias": (2,)}

    key, k_init = jax.random.split(key)
    encode = init_eigenmodel(param_shapes, rank_dict, n_features, k_init)

    # Small p_chunk_target so the streamed p-chunk path (n_chunks > 1) is
    # exercised even at these toy sizes (fc1.weight -> 2 chunks of 256).
    prepared = prepare_eigenmodel(encode, n_features, p_chunk_target=256)

    # synthetic per-sample gradients (what compute_gradients would return)
    grads = {}
    for name, shp in param_shapes.items():
        key, kg = jax.random.split(key)
        grads[name] = jax.random.normal(kg, (batch,) + shp, jnp.float32)

    out = eigenmodel_forward(prepared, grads)
    out = jax.block_until_ready(out)

    ref = jax.block_until_ready(ref_forward(encode, grads))
    assert out.shape == (batch, n_features), out.shape
    max_ref = float(jnp.max(jnp.abs(ref)))
    max_err = float(jnp.max(jnp.abs(out - ref)))
    assert max_err <= 3e-2 * max_ref + 1e-7, (max_err, max_ref)

    print("KERNEL_OK")
</pallas_src>

<mosaic_0001>
module attributes {stable_mosaic.version = 11 : i64} {
  func.func @kernel(%arg0: i32, %arg1: i32, %arg2: memref<4x8x128xf32, #tpu.memory_space<vmem>>, %arg3: memref<4x8x128xf32, #tpu.memory_space<vmem>>, %arg4: memref<8x32x128xf32, #tpu.memory_space<vmem>>, %arg5: memref<2x256xf32, #tpu.memory_space<vmem>>, %arg6: memref<2x128xf32, #tpu.memory_space<vmem>>) attributes {dimension_semantics = [#tpu.dimension_semantics<parallel>, #tpu.dimension_semantics<arbitrary>], iteration_bounds = array<i64: 1, 2>, scalar_prefetch = 0 : i64, scratch_operands = 0 : i64, tpu.core_type = #tpu.core_type<tc>, window_params = [{transform_indices = @transform_0, window_bounds = array<i64: 4, 8, 128>}, {transform_indices = @transform_1, window_bounds = array<i64: 4, 8, 128>}, {transform_indices = @transform_2, window_bounds = array<i64: 8, 32, 128>}, {transform_indices = @transform_3, window_bounds = array<i64: 2, 256>}, {transform_indices = @transform_4, window_bounds = array<i64: 2, 128>}]} {
    %c0 = arith.constant 0 : index
    %c0_0 = arith.constant 0 : index
    %c0_1 = arith.constant 0 : index
    %0 = vector.load %arg2[%c0, %c0_0, %c0_1] : memref<4x8x128xf32, #tpu.memory_space<vmem>>, vector<4x8x128xf32>
    %1 = vector.extract_strided_slice %0 {offsets = [0, 0, 0], sizes = [1, 8, 128], strides = [1, 1, 1]} : vector<4x8x128xf32> to vector<1x8x128xf32>
    %c0_2 = arith.constant 0 : index
    %c0_3 = arith.constant 0 : index
    %c0_4 = arith.constant 0 : index
    %2 = vector.load %arg3[%c0_2, %c0_3, %c0_4] : memref<4x8x128xf32, #tpu.memory_space<vmem>>, vector<1x8x128xf32>
    %3 = vector.shape_cast %2 : vector<1x8x128xf32> to vector<8x128xf32>
    %4 = vector.shape_cast %3 : vector<8x128xf32> to vector<8x1x128xf32>
    %5 = vector.broadcast %1 : vector<1x8x128xf32> to vector<8x8x128xf32>
    %6 = vector.broadcast %4 : vector<8x1x128xf32> to vector<8x8x128xf32>
    %7 = arith.mulf %5, %6 : vector<8x8x128xf32>
    %8 = vector.extract_strided_slice %0 {offsets = [1, 0, 0], sizes = [1, 8, 128], strides = [1, 1, 1]} : vector<4x8x128xf32> to vector<1x8x128xf32>
    %c1 = arith.constant 1 : index
    %c0_5 = arith.constant 0 : index
    %c0_6 = arith.constant 0 : index
    %9 = vector.load %arg3[%c1, %c0_5, %c0_6] : memref<4x8x128xf32, #tpu.memory_space<vmem>>, vector<1x8x128xf32>
    %10 = vector.shape_cast %9 : vector<1x8x128xf32> to vector<8x128xf32>
    %11 = vector.shape_cast %10 : vector<8x128xf32> to vector<8x1x128xf32>
    %12 = vector.broadcast %8 : vector<1x8x128xf32> to vector<8x8x128xf32>
    %13 = vector.broadcast %11 : vector<8x1x128xf32> to vector<8x8x128xf32>
    %14 = arith.mulf %12, %13 : vector<8x8x128xf32>
    %15 = arith.addf %7, %14 : vector<8x8x128xf32>
    %16 = vector.extract_strided_slice %0 {offsets = [2, 0, 0], sizes = [1, 8, 128], strides = [1, 1, 1]} : vector<4x8x128xf32> to vector<1x8x128xf32>
    %c2 = arith.constant 2 : index
    %c0_7 = arith.constant 0 : index
    %c0_8 = arith.constant 0 : index
    %17 = vector.load %arg3[%c2, %c0_7, %c0_8] : memref<4x8x128xf32, #tpu.memory_space<vmem>>, vector<1x8x128xf32>
    %18 = vector.shape_cast %17 : vector<1x8x128xf32> to vector<8x128xf32>
    %19 = vector.shape_cast %18 : vector<8x128xf32> to vector<8x1x128xf32>
    %20 = vector.broadcast %16 : vector<1x8x128xf32> to vector<8x8x128xf32>
    %21 = vector.broadcast %19 : vector<8x1x128xf32> to vector<8x8x128xf32>
    %22 = arith.mulf %20, %21 : vector<8x8x128xf32>
    %23 = arith.addf %15, %22 : vector<8x8x128xf32>
    %24 = vector.extract_strided_slice %0 {offsets = [3, 0, 0], sizes = [1, 8, 128], strides = [1, 1, 1]} : vector<4x8x128xf32> to vector<1x8x128xf32>
    %c3 = arith.constant 3 : index
    %c0_9 = arith.constant 0 : index
    %c0_10 = arith.constant 0 : index
    %25 = vector.load %arg3[%c3, %c0_9, %c0_10] : memref<4x8x128xf32, #tpu.memory_space<vmem>>, vector<1x8x128xf32>
    %26 = vector.shape_cast %25 : vector<1x8x128xf32> to vector<8x128xf32>
    %27 = vector.shape_cast %26 : vector<8x128xf32> to vector<8x1x128xf32>
    %28 = vector.broadcast %24 : vector<1x8x128xf32> to vector<8x8x128xf32>
    %29 = vector.broadcast %27 : vector<8x1x128xf32> to vector<8x8x128xf32>
    %30 = arith.mulf %28, %29 : vector<8x8x128xf32>
    %31 = arith.addf %23, %30 : vector<8x8x128xf32>
    %32 = vector.extract_strided_slice %31 {offsets = [0, 0, 0], sizes = [8, 1, 128], strides = [1, 1, 1]} : vector<8x8x128xf32> to vector<8x1x128xf32>
    %c0_11 = arith.constant 0 : index
    %c0_12 = arith.constant 0 : index
    %c0_13 = arith.constant 0 : index
    %33 = vector.load %arg4[%c0_11, %c0_12, %c0_13] : memref<8x32x128xf32, #tpu.memory_space<vmem>>, vector<1x32x128xf32>
    %34 = vector.shape_cast %33 : vector<1x32x128xf32> to vector<32x128xf32>
    %35 = vector.shape_cast %34 : vector<32x128xf32> to vector<1x32x128xf32>
    %36 = vector.broadcast %32 : vector<8x1x128xf32> to vector<8x32x128xf32>
    %37 = vector.broadcast %35 : vector<1x32x128xf32> to vector<8x32x128xf32>
    %38 = arith.mulf %36, %37 : vector<8x32x128xf32>
    %39 = vector.extract_strided_slice %31 {offsets = [0, 1, 0], sizes = [8, 1, 128], strides = [1, 1, 1]} : vector<8x8x128xf32> to vector<8x1x128xf32>
    %c1_14 = arith.constant 1 : index
    %c0_15 = arith.constant 0 : index
    %c0_16 = arith.constant 0 : index
    %40 = vector.load %arg4[%c1_14, %c0_15, %c0_16] : memref<8x32x128xf32, #tpu.memory_space<vmem>>, vector<1x32x128xf32>
    %41 = vector.shape_cast %40 : vector<1x32x128xf32> to vector<32x128xf32>
    %42 = vector.shape_cast %41 : vector<32x128xf32> to vector<1x32x128xf32>
    %43 = vector.broadcast %39 : vector<8x1x128xf32> to vector<8x32x128xf32>
    %44 = vector.broadcast %42 : vector<1x32x128xf32> to vector<8x32x128xf32>
    %45 = arith.mulf %43, %44 : vector<8x32x128xf32>
    %46 = arith.addf %38, %45 : vector<8x32x128xf32>
    %47 = vector.extract_strided_slice %31 {offsets = [0, 2, 0], sizes = [8, 1, 128], strides = [1, 1, 1]} : vector<8x8x128xf32> to vector<8x1x128xf32>
    %c2_17 = arith.constant 2 : index
    %c0_18 = arith.constant 0 : index
    %c0_19 = arith.constant 0 : index
    %48 = vector.load %arg4[%c2_17, %c0_18, %c0_19] : memref<8x32x128xf32, #tpu.memory_space<vmem>>, vector<1x32x128xf32>
    %49 = vector.shape_cast %48 : vector<1x32x128xf32> to vector<32x128xf32>
    %50 = vector.shape_cast %49 : vector<32x128xf32> to vector<1x32x128xf32>
    %51 = vector.broadcast %47 : vector<8x1x128xf32> to vector<8x32x128xf32>
    %52 = vector.broadcast %50 : vector<1x32x128xf32> to vector<8x32x128xf32>
    %53 = arith.mulf %51, %52 : vector<8x32x128xf32>
    %54 = arith.addf %46, %53 : vector<8x32x128xf32>
    %55 = vector.extract_strided_slice %31 {offsets = [0, 3, 0], sizes = [8, 1, 128], strides = [1, 1, 1]} : vector<8x8x128xf32> to vector<8x1x128xf32>
    %c3_20 = arith.constant 3 : index
    %c0_21 = arith.constant 0 : index
    %c0_22 = arith.constant 0 : index
    %56 = vector.load %arg4[%c3_20, %c0_21, %c0_22] : memref<8x32x128xf32, #tpu.memory_space<vmem>>, vector<1x32x128xf32>
    %57 = vector.shape_cast %56 : vector<1x32x128xf32> to vector<32x128xf32>
    %58 = vector.shape_cast %57 : vector<32x128xf32> to vector<1x32x128xf32>
    %59 = vector.broadcast %55 : vector<8x1x128xf32> to vector<8x32x128xf32>
    %60 = vector.broadcast %58 : vector<1x32x128xf32> to vector<8x32x128xf32>
    %61 = arith.mulf %59, %60 : vector<8x32x128xf32>
    %62 = arith.addf %54, %61 : vector<8x32x128xf32>
    %63 = vector.extract_strided_slice %31 {offsets = [0, 4, 0], sizes = [8, 1, 128], strides = [1, 1, 1]} : vector<8x8x128xf32> to vector<8x1x128xf32>
    %c4 = arith.constant 4 : index
    %c0_23 = arith.constant 0 : index
    %c0_24 = arith.constant 0 : index
    %64 = vector.load %arg4[%c4, %c0_23, %c0_24] : memref<8x32x128xf32, #tpu.memory_space<vmem>>, vector<1x32x128xf32>
    %65 = vector.shape_cast %64 : vector<1x32x128xf32> to vector<32x128xf32>
    %66 = vector.shape_cast %65 : vector<32x128xf32> to vector<1x32x128xf32>
    %67 = vector.broadcast %63 : vector<8x1x128xf32> to vector<8x32x128xf32>
    %68 = vector.broadcast %66 : vector<1x32x128xf32> to vector<8x32x128xf32>
    %69 = arith.mulf %67, %68 : vector<8x32x128xf32>
    %70 = arith.addf %62, %69 : vector<8x32x128xf32>
    %71 = vector.extract_strided_slice %31 {offsets = [0, 5, 0], sizes = [8, 1, 128], strides = [1, 1, 1]} : vector<8x8x128xf32> to vector<8x1x128xf32>
    %c5 = arith.constant 5 : index
    %c0_25 = arith.constant 0 : index
    %c0_26 = arith.constant 0 : index
    %72 = vector.load %arg4[%c5, %c0_25, %c0_26] : memref<8x32x128xf32, #tpu.memory_space<vmem>>, vector<1x32x128xf32>
    %73 = vector.shape_cast %72 : vector<1x32x128xf32> to vector<32x128xf32>
    %74 = vector.shape_cast %73 : vector<32x128xf32> to vector<1x32x128xf32>
    %75 = vector.broadcast %71 : vector<8x1x128xf32> to vector<8x32x128xf32>
    %76 = vector.broadcast %74 : vector<1x32x128xf32> to vector<8x32x128xf32>
    %77 = arith.mulf %75, %76 : vector<8x32x128xf32>
    %78 = arith.addf %70, %77 : vector<8x32x128xf32>
    %79 = vector.extract_strided_slice %31 {offsets = [0, 6, 0], sizes = [8, 1, 128], strides = [1, 1, 1]} : vector<8x8x128xf32> to vector<8x1x128xf32>
    %c6 = arith.constant 6 : index
    %c0_27 = arith.constant 0 : index
    %c0_28 = arith.constant 0 : index
    %80 = vector.load %arg4[%c6, %c0_27, %c0_28] : memref<8x32x128xf32, #tpu.memory_space<vmem>>, vector<1x32x128xf32>
    %81 = vector.shape_cast %80 : vector<1x32x128xf32> to vector<32x128xf32>
    %82 = vector.shape_cast %81 : vector<32x128xf32> to vector<1x32x128xf32>
    %83 = vector.broadcast %79 : vector<8x1x128xf32> to vector<8x32x128xf32>
    %84 = vector.broadcast %82 : vector<1x32x128xf32> to vector<8x32x128xf32>
    %85 = arith.mulf %83, %84 : vector<8x32x128xf32>
    %86 = arith.addf %78, %85 : vector<8x32x128xf32>
    %87 = vector.extract_strided_slice %31 {offsets = [0, 7, 0], sizes = [8, 1, 128], strides = [1, 1, 1]} : vector<8x8x128xf32> to vector<8x1x128xf32>
    %c7 = arith.constant 7 : index
    %c0_29 = arith.constant 0 : index
    %c0_30 = arith.constant 0 : index
    %88 = vector.load %arg4[%c7, %c0_29, %c0_30] : memref<8x32x128xf32, #tpu.memory_space<vmem>>, vector<1x32x128xf32>
    %89 = vector.shape_cast %88 : vector<1x32x128xf32> to vector<32x128xf32>
    %90 = vector.shape_cast %89 : vector<32x128xf32> to vector<1x32x128xf32>
    %91 = vector.broadcast %87 : vector<8x1x128xf32> to vector<8x32x128xf32>
    %92 = vector.broadcast %90 : vector<1x32x128xf32> to vector<8x32x128xf32>
    %93 = arith.mulf %91, %92 : vector<8x32x128xf32>
    %94 = arith.addf %86, %93 : vector<8x32x128xf32>
    %95 = vector.shape_cast %94 : vector<8x32x128xf32> to vector<256x128xf32>
    %96 = arith.truncf %95 : vector<256x128xf32> to vector<256x128xbf16>
    %c0_31 = arith.constant 0 : index
    %c0_32 = arith.constant 0 : index
    %97 = vector.load %arg5[%c0_31, %c0_32] : memref<2x256xf32, #tpu.memory_space<vmem>>, vector<2x256xf32>
    %98 = arith.truncf %97 : vector<2x256xf32> to vector<2x256xbf16>
    %cst = arith.constant dense<0.000000e+00> : vector<2x128xf32>
    %99 = tpu.matmul %98, %96, %cst {dimension_numbers = #tpu.dot_dimension_numbers<[1], [0], [0], [1], [0, 0, 1, 1], [], []>} : vector<2x256xbf16>, vector<256x128xbf16>, vector<2x128xf32> -> vector<2x128xf32>
    %c0_i32 = arith.constant 0 : i32
    %100 = arith.cmpi eq, %arg1, %c0_i32 : i32
    %101 = arith.extui %100 : i1 to i32
    %c0_i32_33 = arith.constant 0 : i32
    %102 = arith.cmpi ne, %101, %c0_i32_33 : i32
    scf.if %102 {
      %c0_36 = arith.constant 0 : index
      %c0_37 = arith.constant 0 : index
      %106 = vector.load %arg6[%c0_36, %c0_37] : memref<2x128xf32, #tpu.memory_space<vmem>>, vector<2x128xf32>
      tpu.vector_store %arg6[%c0_36, %c0_37], %99 {strides = array<i32>} : memref<2x128xf32, #tpu.memory_space<vmem>>, vector<2x128xf32>,
    } else {
    }
    %c0_i32_34 = arith.constant 0 : i32
    %103 = arith.cmpi sgt, %arg1, %c0_i32_34 : i32
    %104 = arith.extui %103 : i1 to i32
    %c0_i32_35 = arith.constant 0 : i32
    %105 = arith.cmpi ne, %104, %c0_i32_35 : i32
    scf.if %105 {
      %c0_36 = arith.constant 0 : index
      %c0_37 = arith.constant 0 : index
      %106 = vector.load %arg6[%c0_36, %c0_37] : memref<2x128xf32, #tpu.memory_space<vmem>>, vector<2x128xf32>
      %107 = arith.addf %106, %99 : vector<2x128xf32>
      %c0_38 = arith.constant 0 : index
      %c0_39 = arith.constant 0 : index
      %108 = vector.load %arg6[%c0_38, %c0_39] : memref<2x128xf32, #tpu.memory_space<vmem>>, vector<2x128xf32>
      tpu.vector_store %arg6[%c0_38, %c0_39], %107 {strides = array<i32>} : memref<2x128xf32, #tpu.memory_space<vmem>>, vector<2x128xf32>,
    } else {
    }
    return
  }
  func.func @transform_0(%arg0: i32, %arg1: i32) -> (i32, i32, i32) {
    %c0_i32 = arith.constant 0 : i32
    %c0_i32_0 = arith.constant 0 : i32
    %c0_i32_1 = arith.constant 0 : i32
    return %c0_i32, %c0_i32_0, %arg0 : i32, i32, i32
  }
  func.func @transform_1(%arg0: i32, %arg1: i32) -> (i32, i32, i32) {
    %c0_i32 = arith.constant 0 : i32
    %c0_i32_0 = arith.constant 0 : i32
    return %c0_i32, %arg1, %arg0 : i32, i32, i32
  }
  func.func @transform_2(%arg0: i32, %arg1: i32) -> (i32, i32, i32) {
    %c0_i32 = arith.constant 0 : i32
    %c0_i32_0 = arith.constant 0 : i32
    %c0_i32_1 = arith.constant 0 : i32
    return %c0_i32, %c0_i32_0, %arg0 : i32, i32, i32
  }
  func.func @transform_3(%arg0: i32, %arg1: i32) -> (i32, i32) {
    %c0_i32 = arith.constant 0 : i32
    %c0_i32_0 = arith.constant 0 : i32
    return %c0_i32, %arg1 : i32, i32
  }
  func.func @transform_4(%arg0: i32, %arg1: i32) -> (i32, i32) {
    %c0_i32 = arith.constant 0 : i32
    %c0_i32_0 = arith.constant 0 : i32
    return %c0_i32, %arg0 : i32, i32
  }
}

</mosaic_0001>

<bundles_post_ra>
// kernel: tpu_custom_call.1
= control target key start
LH: loop header
LB: loop body
LE: loop exit
PB: predicated region body
PF: predicated region fallthrough
CT: control target
= control target key end

     0   :  { %s2537_s0 = inlined_call_operand.hbm [shape: f32[4,8,128], index: 0, kind: input, shape index: {}]   ;;  %s2538_s1 = inlined_call_operand.hbm [shape: f32[4,16,128], index: 1, kind: input, shape index: {}]   ;;  %s2539_s2 = inlined_call_operand.hbm [shape: f32[8,32,128], index: 2, kind: input, shape index: {}]   ;;  %s2540_s3 = inlined_call_operand.hbm [shape: f32[2,512], index: 3, kind: input, shape index: {}]   ;;  %s2541_s4 = inlined_call_operand.hbm [shape: f32[2,128], index: 4, kind: output, shape index: {}]  }
   0x1   :  { %2602 = sst [smem:[#allocation41_spill]] %s2537_s0 }
   0x2   :  { %2603 = sst [smem:[#allocation42_spill]] %s2538_s1 }
   0x3   :  { %2604 = sst [smem:[#allocation43_spill]] %s2539_s2 }
   0x4   :  { %9 = vsyncpa [#allocation3], 0 }
   0x5   :  { %10 = vsyncpa [#allocation6], 0 }
   0x6   :  { %12 = vsyncpa [#allocation6 + $0x1], 0 }
   0x7   :  { %13 = vsyncpa [#allocation9], 0 }
   0x8   :  { %15 = vsyncpa [#allocation9 + $0x1], 0 }
   0x9   :  { %16 = vsyncpa [#allocation4], 0  ;;  %s1644_s15 = smov 0   ;;  %s1646_s16 = smov 0  }
   0xa   :  { %s1648_s17 = smov 0   ;;  %s1650_s18 = smov 0  }
   0xb   :  { %s1652_s19 = smov 0   ;;  %s1654_s20 = smov 0  }
   0xc LB: > { %s1673_s21 = sadd.s32 4294967295, %s1611_s20   ;;  %s69_s22 = sadd.s32 1, %s1599_s17  ;;  %s1611_s20 = sphi %s1654_s20, %s22_s20   ;;  %s1607_s19 = sphi %s1652_s19, %s2694_s19   ;;  %s1603_s18 = sphi %s1650_s18, %s2693_s18   ;;  %s1599_s17 = sphi %s1648_s17, %s2692_s17   ;;  %s1595_s16 = sphi %s1646_s16, %s2691_s16   ;;  %s1591_s15 = sphi %s1644_s15, %s2690_s15  }
   0xd   : > { %p76_p0 = scmp.ne.s32.totalorder %s1599_s17, %s1595_s16  ;;  %p77_p1 = scmp.eq.s32.totalorder %s1611_s20, 0 }
   0xe   : > { %p82_p2 = scmp.ne.s32.totalorder %s1595_s16, %s1591_s15  ;;  %p83_p3 = scmp.eq.s32.totalorder %s1673_s21, 0 }
   0xf   : > { %p1681_p4 = por %p77_p1, %p76_p0  ;;  %p1244_p5 = scmp.ge.s32.totalorder %s1611_s20, 1 }
  0x10   : > { %p1688_p6 = por %p83_p3, %p82_p2  ;;  %p171_p7 = scmp.lt.s32.totalorder %s1611_s20, 3 }
  0x11   : > { %s2608_s2 = sld [smem:[#allocation43_spill]]  ;;  %s1613_s29 = smov [#allocation7]  }
  0x12   : > { %p1693_p8 = pnand %p1244_p5, %p171_p7  ;;  %s202_s30 = sshll.u32 %s1613_s29, 4  ;;  %s203_s30 = int_to_ptr.vmem [resolvable:$true] %s202_s30 }
  0x13   : > { %p1300_p11 = scmp.lt.s32.totalorder %s1611_s20, 2  ;;  %s2542_s5 = smov 128  }
  0x14   : > { %p1284_p9 = pneg %p1693_p8  ;;  %s1615_s6 = smov 8  }
  0x15   : > { %p1710_p12 = pnand %p1300_p11, %p1681_p4  ;;  %s2610_s0 = sld [smem:[#allocation41_spill]] }
  0x16   : > { %p1285_p10 = pnand %p1284_p9, %p83_p3  ;;  %s1616_s11 = smov [#allocation2]  }
  0x17   : > { %s200_s28 = sshll.u32 %s2608_s2, 4  ;;  %s186_s12 = sshll.u32 %s1616_s11, 4  ;;  %s201_s28 = int_to_ptr.hbm [resolvable:$true] %s200_s28  ;;  %s187_s12 = int_to_ptr.vmem [resolvable:$true] %s186_s12 }
  0x18   : > { %1290 = dma.hbm_to_vmem [thread:$0]  (!%p1285_p10), %s201_s28, 4096, %s203_s30, [#allocation6], %s2542_s5, %s2542_s5, %s1615_s6  }
  0x19   : > { %s216_s13 = sand.u32 1, %s1611_s20   ;;  %s31_s14 = sadd.s32 1, %s1607_s19 }
  0x1a   : > { %p32_p13 = scmp.ge.s32.totalorder %s31_s14, 2  ;;  %s218_s15 = sand.u32 1, %s1599_s17  }
  0x1b   : > { %s184_s10 = sshll.u32 %s2610_s0, 4  ;;  %s1248_s23 = sshll.u32 %s218_s15, 5  ;;  %s185_s10 = int_to_ptr.hbm [resolvable:$true] %s184_s10 }
  0x1c   : > { %1287 = dma.hbm_to_vmem [thread:$0]  (!%p1285_p10), %s185_s10, 512, %s187_s12, [#allocation3], %s2542_s5, %s2542_s5, %s1615_s6  }
  0x1d   : > { %s1249_s26 = sshll.u32 %s1607_s19, 3  ;;  %s2696_s14 = smov (%p32_p13, %s31_s14), 0 }
  0x1e   : > { %s2611_s1 = sld [smem:[#allocation42_spill]]  ;;  %s64_s30 = ssub.s32 %s1607_s19, %s2696_s14 }
  0x1f   : > { %p67_p0 = scmp.eq.s32.totalorder %s64_s30, 0  ;;  %s220_s9 = scalar_lea.vmem [#allocation5], %s1248_s23 }
  0x20   : > { %s228_s10 = sshll.u32 %s220_s9, 4  ;;  %s217_s12 = scalar_lea.sflag [#allocation6], %s216_s13  ;;  %s229_s10 = int_to_ptr.vmem [resolvable:$true] %s228_s10 }
  0x21   : > { %s1734_s11 = scalar_select %p67_p0, %s1599_s17, %s69_s22  }
  0x22   : > { %s1617_s5 = smov 256   ;;  %s2612_s0 = smov 128  }
  0x23   : > { %s1250_s27 = sshll.u32 %s218_s15, 2  ;;  %s1267_s28 = sshll.u32 %s1607_s19, 2 }
  0x24   : > { %s225_s29 = scalar_lea.hbm %s2611_s1, %s1249_s26  ;;  %s242_s23 = scalar_lea.vmem [#allocation8], %s1250_s27 }
  0x25   : > { %s226_s8 = sshll.u32 %s225_s29, 4  ;;  %s247_s29 = scalar_lea.hbm %s2540_s3, %s1267_s28  ;;  %s227_s8 = int_to_ptr.hbm [resolvable:$true] %s226_s8 }
  0x26   : > { %1294 = dma.hbm_to_vmem [thread:$0]  (!%p1710_p12), %s227_s8, 512, %s229_s10, %s217_s12, %s1617_s5, %s2612_s0, %s1615_s6  }
  0x27   : > { %s249_s30 = sshll.u32 %s247_s29, 4  ;;  %s251_s2 = sshll.u32 %s242_s23, 4  ;;  %s250_s30 = int_to_ptr.hbm [resolvable:$true] %s249_s30  ;;  %s252_s2 = int_to_ptr.vmem [resolvable:$true] %s251_s2 }
  0x28   : > { %s239_s22 = scalar_lea.sflag [#allocation9], %s218_s15  ;;  %260 = sbr.rel (%p1693_p8) target bundleno = 394 (0x18a), region = 36 }
  0x29   : > { %1297 = dma.hbm_to_vmem [thread:$0]  (!%p1710_p12), %s250_s30, 64, %s252_s2, %s239_s22  }
  0x2d   : > { %1570 = dma.done.wait (%p83_p3), [#allocation3], 512  }
  0x2e   : > { %1572 = vsyncadd (%p83_p3), [#allocation3], 4294966784  ;;  %s267_s0 = sand.u32 1, %s1673_s21   ;;  %s269_s1 = sand.u32 1, %s1595_s16  }
  0x2f   : > { %s1255_s5 = sshll.u32 %s269_s1, 5  ;;  %s268_s6 = scalar_lea.sflag [#allocation6], %s267_s0 }
  0x30   : > { %s1754_s13 = scalar_lea.vmem [#allocation5], %s1255_s5 }
  0x31   : > { %1574 = dma.done.wait (%p1688_p6), %s268_s6, 512  }
  0x32   : > { %1576 = vsyncadd (%p1688_p6), %s268_s6, 4294966784 }
  0x33   : > { %1578 = dma.done.wait (%p83_p3), [#allocation6], 4096  }
  0x34   : > { %1580 = vsyncadd (%p83_p3), [#allocation6], 4294963200  ;;  %s1257_s2 = sshll.u32 %s269_s1, 2  ;;  %s283_s25 = scalar_lea.sflag [#allocation9], %s269_s1 }
  0x35   : > { %s1764_s7 = scalar_lea.vmem [#allocation8], %s1257_s2 }
  0x36   : > { %1582 = dma.done.wait (%p1688_p6), %s283_s25, 64  }
  0x37   : > { %1584 = vsyncadd (%p1688_p6), %s283_s25, 4294967232  ;;  %v1771_v0 = vld [vmem:[%s1754_s13] sm:$0xff]  ;;  %v1774_v1 = vld [vmem:[%s1754_s13 + $0x8] sm:$0xff]  ;;  %p1261_p1 = scmp.ne.s32.totalorder %s1603_s18, 0 }
  0x38   : > { %2613 = vst [vmem:[#allocation16_spill] sm:$0xff] %v1771_v0  ;;  %v321_v2 = vrot.slane %v1771_v0, 3  ;;  %v355_v3 = vrot.slane %v1774_v1, 3  ;;  %v1779_v4 = vld [vmem:[%s1754_s13 + $0x10] sm:$0xff]  ;;  %v1782_v5 = vld [vmem:[%s1754_s13 + $0x18] sm:$0xff]  ;;  %v325_v6 = vrot.slane %v1771_v0, 7 }
  0x39   : > { %2614 = vst [vmem:[#allocation17_spill] sm:$0xff] %v1774_v1  ;;  %v1785_v7 = vld [vmem:[#allocation2] sm:$0xff]  ;;  %v1787_v8 = vld [vmem:[#allocation2 + $0x8] sm:$0xff]  ;;  %v397_v9 = vrot.slane %v1779_v4, 3  ;;  %v439_v10 = vrot.slane %v1782_v5, 3  ;;  %v359_v11 = vrot.slane %v1774_v1, 7 }
  0x3a   : > { %2615 = vst [vmem:[#allocation18_spill] sm:$0xff] %v1779_v4  ;;  %v1792_v12 = vld [vmem:[#allocation2 + $0x10] sm:$0xff]  ;;  %v1794_v13 = vld [vmem:[#allocation2 + $0x18] sm:$0xff]  ;;  %v329_v14 = vperm.slane %v321_v2, 0  ;;  %v363_v15 = vperm.slane %v355_v3, 0  ;;  %v333_v16 = vperm.slane %v325_v6, 0 }
  0x3b   : > { %2616 = vst [vmem:[#allocation19_spill] sm:$0xff] %v1782_v5  ;;  %v405_v17 = vperm.slane %v397_v9, 0  ;;  %v447_v18 = vperm.slane %v439_v10, 0  ;;  %v367_v19 = vperm.slane %v359_v11, 0  ;;  %v401_v23 = vrot.slane %v1779_v4, 7  ;;  %v1809_v40 = vld [vmem:[#allocation7 + $0x10] sm:$0xff] }
  0x3c   : > { %2617 = vst [vmem:[#allocation20_spill] sm:$0xff] %v1785_v7  ;;  %v345_v20 = vmul.f32 %v329_v14, %v1785_v7  ;;  %v379_v21 = vmul.f32 %v363_v15, %v1787_v8  ;;  %v349_v22 = vmul.f32 %v333_v16, %v1785_v7  ;;  %v443_v27 = vrot.slane %v1782_v5, 7  ;;  %v1813_v44 = vld [vmem:[#allocation7 + $0x18] sm:$0xff]  ;;  %v1815_v45 = vld [vmem:[#allocation7 + $0x30] sm:$0xff] }
  0x3d   : > { %2618 = vst [vmem:[#allocation21_spill] sm:$0xff] %v1787_v8  ;;  %v421_v24 = vmul.f32 %v405_v17, %v1792_v12  ;;  %v463_v25 = vmul.f32 %v447_v18, %v1794_v13  ;;  %v383_v26 = vmul.f32 %v367_v19, %v1787_v8  ;;  %v409_v29 = vperm.slane %v401_v23, 0  ;;  %v1817_v46 = vld [vmem:[#allocation7 + $0x38] sm:$0xff]  ;;  %v1823_v50 = vld [vmem:[#allocation7 + $0x50] sm:$0xff] }
  0x3e   : > { %2619 = vst [vmem:[#allocation22_spill] sm:$0xff] %v1792_v12  ;;  %v387_v28 = vadd.f32 %v379_v21, %v345_v20  ;;  %v320_v30 = vrot.slane %v1771_v0, 2  ;;  %v354_v31 = vrot.slane %v1774_v1, 2  ;;  %v451_v33 = vperm.slane %v443_v27, 0  ;;  %v1825_v51 = vld [vmem:[#allocation7 + $0x58] sm:$0xff]  ;;  %v1827_v52 = vld [vmem:[#allocation7 + $0x70] sm:$0xff] }
  0x3f   : > { %2620 = vst [vmem:[#allocation23_spill] sm:$0xff] %v1794_v13  ;;  %v391_v32 = vadd.f32 %v383_v26, %v349_v22  ;;  %v324_v34 = vrot.slane %v1771_v0, 6  ;;  %v358_v35 = vrot.slane %v1774_v1, 6  ;;  %v425_v37 = vmul.f32 %v409_v29, %v1792_v12  ;;  %v1840_v60 = vld [vmem:[#allocation7 + $0x78] sm:$0xff]  ;;  %v1844_v62 = vld [vmem:[#allocation7 + $0x90] sm:$0xff] }
  0x40   : > { %v429_v36 = vadd.f32 %v421_v24, %v387_v28  ;;  %v328_v38 = vperm.slane %v320_v30, 0  ;;  %v362_v39 = vperm.slane %v354_v31, 0  ;;  %2621 = vst [vmem:[#allocation24_spill] sm:$0xff] %v1809_v40  ;;  %v467_v41 = vmul.f32 %v451_v33, %v1794_v13  ;;  %v1846_v63 = vld [vmem:[#allocation7 + $0x98] sm:$0xff]  ;;  %v1850_v3 = vld [vmem:[#allocation7 + $0xb0] sm:$0xff]  ;;  %v1884_v30 = vld [vmem:[#allocation7] sm:$0xff] }
  0x41   : > { %v396_v42 = vrot.slane %v1779_v4, 2  ;;  %2622 = vst [vmem:[#allocation25_spill] sm:$0xff] %v1813_v44  ;;  %v433_v47 = vadd.f32 %v425_v37, %v391_v32  ;;  %v1819_v48 = vperm.slane %v324_v34, 0  ;;  %v1821_v49 = vperm.slane %v358_v35, 0  ;;  %v1862_v17 = vld [vmem:[#allocation7 + $0xb8] sm:$0xff]  ;;  %v1864_v18 = vld [vmem:[#allocation7 + $0xd0] sm:$0xff] }
  0x42   : > { %v471_v43 = vadd.f32 %v463_v25, %v429_v36  ;;  %2623 = vst [vmem:[#allocation26_spill] sm:$0xff] %v1815_v45  ;;  %v1830_v53 = vmul.f32 %v328_v38, %v1785_v7  ;;  %v1833_v54 = vmul.f32 %v362_v39, %v1787_v8  ;;  %v1866_v19 = vld [vmem:[#allocation7 + $0xd8] sm:$0xff]  ;;  %v1876_v24 = vld [vmem:[#allocation7 + $0xf0] sm:$0xff]  ;;  %v1886_v31 = vld [vmem:[#allocation7 + $0x8] sm:$0xff] }
  0x43   : > { %2624 = vst [vmem:[#allocation27_spill] sm:$0xff] %v1827_v52  ;;  %v1835_v55 = vperm.slane %v396_v42, 0  ;;  %v1878_v25 = vld [vmem:[#allocation7 + $0xf8] sm:$0xff]  ;;  %v1888_v32 = vld [vmem:[#allocation7 + $0x20] sm:$0xff]  ;;  %v1898_v37 = vld [vmem:[#allocation7 + $0x28] sm:$0xff] }
  0x44   : > { %v483_v57 = vperm.slane %v471_v43, 0  ;;  %v528_v58 = vperm.slane %v471_v43, 1  ;;  %v1838_v59 = vperm.slane %v471_v43, 2  ;;  %v1842_v61 = vperm.slane %v471_v43, 3  ;;  %2626 = vst [vmem:[#allocation29_spill] sm:$0xff] %v1844_v62  ;;  %v1900_v38 = vld [vmem:[#allocation7 + $0x40] sm:$0xff] }
  0x45   : > { %2625 = vst [vmem:[#allocation28_spill] sm:$0xff] %v1835_v55  ;;  %v1848_v2 = vperm.slane %v471_v43, 4  ;;  %v1852_v6 = vperm.slane %v471_v43, 5  ;;  %v1854_v9 = vperm.slane %v471_v43, 6  ;;  %v1856_v10 = vperm.slane %v471_v43, 7 }
  0x46   : > { %2627 = vst [vmem:[#allocation30_spill] sm:$0xff] %v1846_v63  ;;  %v502_v11 = vmul.f32 %v483_v57, %v1809_v40  ;;  %v503_v14 = vmul.f32 %v483_v57, %v1813_v44  ;;  %v547_v15 = vmul.f32 %v528_v58, %v1815_v45  ;;  %v548_v16 = vmul.f32 %v528_v58, %v1817_v46 }
  0x47   : > { %2628 = vst [vmem:[#allocation31_spill] sm:$0xff] %v1866_v19  ;;  %v624_v20 = vmul.f32 %v1838_v59, %v1823_v50  ;;  %v625_v21 = vmul.f32 %v1838_v59, %v1825_v51  ;;  %v701_v22 = vmul.f32 %v1842_v61, %v1827_v52  ;;  %v702_v23 = vmul.f32 %v1842_v61, %v1840_v60 }
  0x48   : > { %2629 = vst [vmem:[#allocation32_spill] sm:$0xff] %v1876_v24  ;;  %v579_v26 = vadd.f32 %v547_v15, %v502_v11  ;;  %v580_v27 = vadd.f32 %v548_v16, %v503_v14  ;;  %v778_v28 = vmul.f32 %v1848_v2, %v1844_v62  ;;  %v779_v29 = vmul.f32 %v1848_v2, %v1846_v63 }
  0x49   : > { %2630 = vst [vmem:[#allocation33_spill] sm:$0xff] %v1878_v25  ;;  %v855_v33 = vmul.f32 %v1852_v6, %v1850_v3  ;;  %v856_v34 = vmul.f32 %v1852_v6, %v1862_v17  ;;  %v932_v35 = vmul.f32 %v1854_v9, %v1864_v18  ;;  %v933_v36 = vmul.f32 %v1854_v9, %v1866_v19 }
  0x4a   : > { %2631 = vst [vmem:[#allocation34_spill] sm:$0xff] %v1884_v30  ;;  %v656_v39 = vadd.f32 %v624_v20, %v579_v26  ;;  %v657_v42 = vadd.f32 %v625_v21, %v580_v27  ;;  %v1009_v43 = vmul.f32 %v1856_v10, %v1876_v24  ;;  %v1010_v11 = vmul.f32 %v1856_v10, %v1878_v25 }
  0x4b   : > { %2632 = vst [vmem:[#allocation35_spill] sm:$0xff] %v1888_v32  ;;  %v475_v14 = vadd.f32 %v467_v41, %v433_v47  ;;  %v500_v15 = vmul.f32 %v483_v57, %v1884_v30  ;;  %v501_v16 = vmul.f32 %v483_v57, %v1886_v31  ;;  %v545_v56 = vmul.f32 %v528_v58, %v1888_v32 }
  0x4c   : > { %2633 = vst [vmem:[#allocation36_spill] sm:$0xff] %v1898_v37  ;;  %v733_v1 = vadd.f32 %v701_v22, %v656_v39  ;;  %v734_v0 = vadd.f32 %v702_v23, %v657_v42  ;;  %v546_v13 = vmul.f32 %v528_v58, %v1898_v37  ;;  %v622_v20 = vmul.f32 %v1838_v59, %v1900_v38 }
  0x4d   : > { %2634 = vst [vmem:[#allocation37_spill] sm:$0xff] %v1900_v38  ;;  %v1912_v21 = vperm.slane %v475_v14, 0  ;;  %v1914_v26 = vperm.slane %v475_v14, 1  ;;  %v1916_v27 = vperm.slane %v475_v14, 2  ;;  %v1918_v41 = vperm.slane %v475_v14, 3 }
  0x4e   : > { %v810_v47 = vadd.f32 %v778_v28, %v733_v1  ;;  %v811_v4 = vadd.f32 %v779_v29, %v734_v0  ;;  %v1920_v57 = vperm.slane %v475_v14, 4  ;;  %v1922_v5 = vperm.slane %v475_v14, 5 }
  0x4f   : > { %v518_v58 = vmul.f32 %v1912_v21, %v1809_v40  ;;  %v519_v22 = vmul.f32 %v1912_v21, %v1813_v44  ;;  %v563_v23 = vmul.f32 %v1914_v26, %v1815_v45  ;;  %v564_v39 = vmul.f32 %v1914_v26, %v1817_v46 }
  0x50   : > { %v887_v42 = vadd.f32 %v855_v33, %v810_v47  ;;  %v888_v55 = vadd.f32 %v856_v34, %v811_v4  ;;  %v640_v0 = vmul.f32 %v1916_v27, %v1823_v50  ;;  %v641_v1 = vmul.f32 %v1916_v27, %v1825_v51 }
  0x51   : > { %v595_v28 = vadd.f32 %v563_v23, %v518_v58  ;;  %v596_v29 = vadd.f32 %v564_v39, %v519_v22  ;;  %v717_v40 = vmul.f32 %v1918_v41, %v1827_v52  ;;  %v718_v44 = vmul.f32 %v1918_v41, %v1840_v60 }
  0x52   : > { %v964_v45 = vadd.f32 %v932_v35, %v887_v42  ;;  %v965_v12 = vadd.f32 %v933_v36, %v888_v55  ;;  %v794_v33 = vmul.f32 %v1920_v57, %v1844_v62  ;;  %v795_v4 = vmul.f32 %v1920_v57, %v1846_v63  ;;  %v1952_v55 = vld [vmem:[#allocation7 + $0x48] sm:$0xff] }
  0x53   : > { %v672_v34 = vadd.f32 %v640_v0, %v595_v28  ;;  %v673_v47 = vadd.f32 %v641_v1, %v596_v29  ;;  %v871_v58 = vmul.f32 %v1922_v5, %v1850_v3  ;;  %v872_v22 = vmul.f32 %v1922_v5, %v1862_v17  ;;  %2635 = vst [vmem:[#allocation38_spill] sm:$0xff] %v1952_v55  ;;  %v1954_v0 = vld [vmem:[#allocation7 + $0x60] sm:$0xff]  ;;  %v1956_v1 = vld [vmem:[#allocation7 + $0x68] sm:$0xff] }
  0x54   : > { %v1041_v23 = vadd.f32 %v1009_v43, %v964_v45  ;;  %v1042_v39 = vadd.f32 %v1010_v11, %v965_v12  ;;  %v1948_v52 = vperm.slane %v475_v14, 6  ;;  %v1950_v35 = vperm.slane %v475_v14, 7  ;;  %2636 = vst [vmem:[#allocation39_spill] sm:$0xff] %v1954_v0  ;;  %v1958_v28 = vld [vmem:[#allocation7 + $0x80] sm:$0xff] }
  0x55   : > { %v749_v36 = vadd.f32 %v717_v40, %v672_v34  ;;  %v750_v42 = vadd.f32 %v718_v44, %v673_v47  ;;  %v577_v62 = vadd.f32 %v545_v56, %v500_v15  ;;  %v578_v63 = vadd.f32 %v546_v13, %v501_v16  ;;  %v1966_v40 = vld [vmem:[#allocation7 + $0x88] sm:$0xff]  ;;  %v1972_v14 = vld [vmem:[#allocation7 + $0xa0] sm:$0xff] }
  0x56   : > { %v1066_v29 = vpack.c.bf16 %v1042_v39, %v1041_v23  ;;  %v948_v12 = vmul.f32 %v1948_v52, %v1864_v18  ;;  %v949_v45 = vmul.f32 %v1948_v52, %v1866_v19  ;;  %v1025_v43 = vmul.f32 %v1950_v35, %v1876_v24  ;;  %v1974_v15 = vld [vmem:[#allocation7 + $0xa8] sm:$0xff]  ;;  %v1976_v16 = vld [vmem:[#allocation7 + $0xc0] sm:$0xff] }
  0x57   : > { %v826_v44 = vadd.f32 %v794_v33, %v749_v36  ;;  %v827_v13 = vadd.f32 %v795_v4, %v750_v42  ;;  %v1026_v56 = vmul.f32 %v1950_v35, %v1878_v25  ;;  %v623_v11 = vmul.f32 %v1838_v59, %v1952_v55  ;;  %v1984_v23 = vld [vmem:[#allocation7 + $0xc8] sm:$0xff]  ;;  %v1988_v25 = vld [vmem:[#allocation7 + $0xe0] sm:$0xff] }
  0x58   : > { %1084 = vmatpush.bf16.msra.mxu0 %v1066_v29  ;;  %v654_v34 = vadd.f32 %v622_v20, %v577_v62  ;;  %v699_v47 = vmul.f32 %v1842_v61, %v1954_v0  ;;  %v700_v33 = vmul.f32 %v1842_v61, %v1956_v1  ;;  %v776_v4 = vmul.f32 %v1848_v2, %v1958_v28  ;;  %v1990_v62 = vld [vmem:[#allocation7 + $0xe8] sm:$0xff] }
  0x59   : > { %v903_v59 = vadd.f32 %v871_v58, %v826_v44  ;;  %v904_v39 = vadd.f32 %v872_v22, %v827_v13  ;;  %v655_v36 = vadd.f32 %v623_v11, %v578_v63  ;;  %v777_v42 = vmul.f32 %v1848_v2, %v1966_v40  ;;  %2637 = vst [vmem:[#allocation40_spill] sm:$0xff] %v1990_v62 }
  0x5a   : > { %v731_v20 = vadd.f32 %v699_v47, %v654_v34  ;;  %v853_v29 = vmul.f32 %v1852_v6, %v1972_v14  ;;  %v854_v61 = vmul.f32 %v1852_v6, %v1974_v15  ;;  %v930_v24 = vmul.f32 %v1854_v9, %v1976_v16 }
  0x5b   : > { %v980_v58 = vadd.f32 %v948_v12, %v903_v59  ;;  %v981_v22 = vadd.f32 %v949_v45, %v904_v39  ;;  %v732_v63 = vadd.f32 %v700_v33, %v655_v36  ;;  %v931_v2 = vmul.f32 %v1854_v9, %v1984_v23 }
  0x5c   : > { %v808_v44 = vadd.f32 %v776_v4, %v731_v20  ;;  %v1007_v13 = vmul.f32 %v1856_v10, %v1988_v25  ;;  %v1008_v11 = vmul.f32 %v1856_v10, %v1990_v62  ;;  %v516_v34 = vmul.f32 %v1912_v21, %v1884_v30 }
  0x5d   : > { %v1057_v6 = vadd.f32 %v1025_v43, %v980_v58  ;;  %v1058_v47 = vadd.f32 %v1026_v56, %v981_v22  ;;  %v809_v19 = vadd.f32 %v777_v42, %v732_v63  ;;  %v517_v12 = vmul.f32 %v1912_v21, %v1886_v31 }
  0x5e   : > { %v885_v45 = vadd.f32 %v853_v29, %v808_v44  ;;  %v561_v9 = vmul.f32 %v1914_v26, %v1888_v32  ;;  %v562_v33 = vmul.f32 %v1914_v26, %v1898_v37  ;;  %v638_v4 = vmul.f32 %v1916_v27, %v1900_v38 }
  0x5f   : > { %v1074_v10 = vpack.c.bf16 %v1058_v47, %v1057_v6  ;;  %v886_v59 = vadd.f32 %v854_v61, %v809_v19  ;;  %v639_v43 = vmul.f32 %v1916_v27, %v1952_v55  ;;  %v715_v56 = vmul.f32 %v1918_v41, %v1954_v0  ;;  %v2639_v6 = vld [vmem:[#allocation28_spill] sm:$0xff] }
  0x60   : > { %v962_v39 = vadd.f32 %v930_v24, %v885_v45  ;;  %v593_v21 = vadd.f32 %v561_v9, %v516_v34  ;;  %v594_v36 = vadd.f32 %v562_v33, %v517_v12  ;;  %v716_v42 = vmul.f32 %v1918_v41, %v1956_v1  ;;  %v2640_v12 = vld [vmem:[#allocation19_spill] sm:$0xff] }
  0x61   : > { %1097 = vmatpush.bf16.msra.mxu1 %v1074_v10  ;;  %v963_v20 = vadd.f32 %v931_v2, %v886_v59  ;;  %v792_v26 = vmul.f32 %v1920_v57, %v1958_v28  ;;  %v348_v19 = vmul.f32 %v1819_v48, %v1785_v7  ;;  %v382_v27 = vmul.f32 %v1821_v49, %v1787_v8 }
  0x62   : > { %v1039_v29 = vadd.f32 %v1007_v13, %v962_v39  ;;  %v670_v61 = vadd.f32 %v638_v4, %v593_v21  ;;  %v671_v58 = vadd.f32 %v639_v43, %v594_v36  ;;  %v793_v24 = vmul.f32 %v1920_v57, %v1966_v40  ;;  %v2642_v4 = vld [vmem:[#allocation18_spill] sm:$0xff] }
  0x63   : > { %v1040_v22 = vadd.f32 %v1008_v11, %v963_v20  ;;  %v869_v41 = vmul.f32 %v1922_v5, %v1972_v14  ;;  %v870_v63 = vmul.f32 %v1922_v5, %v1974_v15  ;;  %v946_v2 = vmul.f32 %v1948_v52, %v1976_v16  ;;  %v2638_v11 = vld [vmem:[#allocation22_spill] sm:$0xff] }
  0x64   : > { %v747_v48 = vadd.f32 %v715_v56, %v670_v61  ;;  %v748_v44 = vadd.f32 %v716_v42, %v671_v58  ;;  %v947_v49 = vmul.f32 %v1948_v52, %v1984_v23  ;;  %v386_v13 = vadd.f32 %v1833_v54, %v1830_v53  ;;  %v2643_v54 = vld [vmem:[#allocation23_spill] sm:$0xff]  ;;  %v2644_v56 = vld [vmem:[#allocation16_spill] sm:$0xff] }
  0x65   : > { %v1065_v34 = vpack.c.bf16 %v1040_v22, %v1039_v29  ;;  %v1023_v57 = vmul.f32 %v1950_v35, %v1988_v25  ;;  %v420_v47 = vmul.f32 %v2639_v6, %v2638_v11  ;;  %v2641_v5 = vrot.slane %v2640_v12, 2  ;;  %v2654_v58 = vld [vmem:[#allocation32_spill] sm:$0xff] }
  0x66   : > { %v824_v9 = vadd.f32 %v792_v26, %v747_v48  ;;  %v825_v33 = vadd.f32 %v793_v24, %v748_v44  ;;  %v400_v10 = vrot.slane %v2642_v4, 6  ;;  %v442_v59 = vrot.slane %v2640_v12, 6 }
  0x67   : > { %v446_v45 = vperm.slane %v2641_v5, 0  ;;  %1085 = vmatpush.bf16.msra.mxu0 %v1065_v34  ;;  %v1024_v52 = vmul.f32 %v1950_v35, %v1990_v62  ;;  %v428_v53 = vadd.f32 %v420_v47, %v386_v13  ;;  %v319_v39 = vrot.slane %v2644_v56, 1 }
  0x68   : > { %v901_v21 = vadd.f32 %v869_v41, %v824_v9  ;;  %v902_v36 = vadd.f32 %v870_v63, %v825_v33  ;;  %v408_v42 = vperm.slane %v400_v10, 0  ;;  %v450_v20 = vperm.slane %v442_v59, 0  ;;  %v2648_v9 = vld [vmem:[#allocation25_spill] sm:$0xff] }
  0x69   : > { %v462_v43 = vmul.f32 %v446_v45, %v2643_v54  ;;  %v390_v26 = vadd.f32 %v382_v27, %v348_v19  ;;  %v2050_v61 = vperm.slane %v319_v39, 0  ;;  %v2647_v27 = vld [vmem:[#allocation24_spill] sm:$0xff]  ;;  %v2650_v39 = vld [vmem:[#allocation27_spill] sm:$0xff] }
  0x6a   : > { %v978_v22 = vadd.f32 %v946_v2, %v901_v21  ;;  %v979_v48 = vadd.f32 %v947_v49, %v902_v36  ;;  %v424_v44 = vmul.f32 %v408_v42, %v2638_v11  ;;  %v466_v35 = vmul.f32 %v450_v20, %v2643_v54  ;;  %v2649_v49 = vld [vmem:[#allocation26_spill] sm:$0xff]  ;;  %v2651_v42 = vld [vmem:[#allocation29_spill] sm:$0xff] }
  0x6b   : > { %v470_v29 = vadd.f32 %v462_v43, %v428_v53  ;;  %2645 = vst [vmem:[#allocation28_spill] sm:$0xff] %v2050_v61 }
  0x6c   : > { %v1055_v41 = vadd.f32 %v1023_v57, %v978_v22  ;;  %v1056_v63 = vadd.f32 %v1024_v52, %v979_v48  ;;  %v2652_v22 = vld [vmem:[#allocation30_spill] sm:$0xff] }
  0x6d   : > { %v482_v13 = vperm.slane %v470_v29, 0  ;;  %v527_v34 = vperm.slane %v470_v29, 1  ;;  %v604_v6 = vperm.slane %v470_v29, 2  ;;  %v2055_v47 = vperm.slane %v470_v29, 3 }
  0x6e   : > { %v2057_v5 = vperm.slane %v470_v29, 4  ;;  %v2059_v19 = vperm.slane %v470_v29, 5  ;;  %v1073_v59 = vpack.c.bf16 %v1056_v63, %v1055_v41  ;;  %v2079_v24 = vperm.slane %v470_v29, 6 }
  0x6f   : > { %v498_v45 = vmul.f32 %v482_v13, %v2647_v27  ;;  %v499_v2 = vmul.f32 %v482_v13, %v2648_v9  ;;  %v543_v33 = vmul.f32 %v527_v34, %v2649_v49  ;;  %v544_v10 = vmul.f32 %v527_v34, %v1817_v46 }
  0x70   : > { %v620_v53 = vmul.f32 %v604_v6, %v1823_v50  ;;  %v621_v43 = vmul.f32 %v604_v6, %v1825_v51  ;;  %v697_v57 = vmul.f32 %v2055_v47, %v2650_v39  ;;  %v698_v36 = vmul.f32 %v2055_v47, %v1840_v60  ;;  %1098 = vmatpush.bf16.msra.mxu1 %v1073_v59  ;;  %v2653_v59 = vld [vmem:[#allocation31_spill] sm:$0xff] }
  0x71   : > { %v575_v52 = vadd.f32 %v543_v33, %v498_v45  ;;  %v576_v21 = vadd.f32 %v544_v10, %v499_v2  ;;  %v774_v20 = vmul.f32 %v2057_v5, %v2651_v42  ;;  %v775_v48 = vmul.f32 %v2057_v5, %v2652_v22 }
  0x72   : > { %v851_v41 = vmul.f32 %v2059_v19, %v1850_v3  ;;  %v852_v63 = vmul.f32 %v2059_v19, %v1862_v17  ;;  %v2081_v33 = vperm.slane %v470_v29, 7  ;;  %v432_v10 = vadd.f32 %v424_v44, %v390_v26 }
  0x73   : > { %v652_v45 = vadd.f32 %v620_v53, %v575_v52  ;;  %v653_v2 = vadd.f32 %v621_v43, %v576_v21  ;;  %v928_v54 = vmul.f32 %v2079_v24, %v1864_v18  ;;  %v929_v11 = vmul.f32 %v2079_v24, %v2653_v59  ;;  %v2655_v53 = vld [vmem:[#allocation33_spill] sm:$0xff] }
  0x74   : > { %v496_v8 = vmul.f32 %v482_v13, %v1884_v30  ;;  %v497_v56 = vmul.f32 %v482_v13, %v1886_v31  ;;  %v1005_v61 = vmul.f32 %v2081_v33, %v2654_v58  ;;  %v1006_v29 = vmul.f32 %v2081_v33, %v2655_v53 }
  0x75   : > { %v729_v12 = vadd.f32 %v697_v57, %v652_v45  ;;  %v730_v4 = vadd.f32 %v698_v36, %v653_v2  ;;  %v474_v43 = vadd.f32 %v466_v35, %v432_v10  ;;  %v541_v26 = vmul.f32 %v527_v34, %v1888_v32 }
  0x76   : > { %v542_v44 = vmul.f32 %v527_v34, %v1898_v37  ;;  %v618_v52 = vmul.f32 %v604_v6, %v1900_v38  ;;  %v619_v30 = vmul.f32 %v604_v6, %v1952_v55  ;;  %v695_v13 = vmul.f32 %v2055_v47, %v1954_v0 }
  0x77   : > { %v806_v21 = vadd.f32 %v774_v20, %v729_v12  ;;  %v807_v7 = vadd.f32 %v775_v48, %v730_v4  ;;  %v486_v57 = vperm.slane %v474_v43, 0  ;;  %v2099_v36 = vperm.slane %v474_v43, 1 }
  0x78   : > { %v2101_v45 = vperm.slane %v474_v43, 2  ;;  %v2103_v2 = vperm.slane %v474_v43, 3  ;;  %v2105_v32 = vperm.slane %v474_v43, 4  ;;  %v2107_v34 = vperm.slane %v474_v43, 5 }
  0x79   : > { %v883_v35 = vadd.f32 %v851_v41, %v806_v21  ;;  %v884_v10 = vadd.f32 %v852_v63, %v807_v7  ;;  %v514_v12 = vmul.f32 %v486_v57, %v2647_v27  ;;  %v515_v4 = vmul.f32 %v486_v57, %v2648_v9 }
  0x7a   : > { %v559_v6 = vmul.f32 %v2099_v36, %v2649_v49  ;;  %v560_v20 = vmul.f32 %v2099_v36, %v1817_v46  ;;  %v636_v41 = vmul.f32 %v2101_v45, %v1823_v50  ;;  %v637_v7 = vmul.f32 %v2101_v45, %v1825_v51 }
  0x7b   : > { %v960_v48 = vadd.f32 %v928_v54, %v883_v35  ;;  %v961_v0 = vadd.f32 %v929_v11, %v884_v10  ;;  %v713_v27 = vmul.f32 %v2103_v2, %v2650_v39  ;;  %v714_v9 = vmul.f32 %v2103_v2, %v1840_v60 }
  0x7c   : > { %v591_v63 = vadd.f32 %v559_v6, %v514_v12  ;;  %v592_v21 = vadd.f32 %v560_v20, %v515_v4  ;;  %v790_v54 = vmul.f32 %v2105_v32, %v2651_v42  ;;  %v791_v11 = vmul.f32 %v2105_v32, %v2652_v22 }
  0x7d   : > { %v1037_v49 = vadd.f32 %v1005_v61, %v960_v48  ;;  %v1038_v55 = vadd.f32 %v1006_v29, %v961_v0  ;;  %v867_v12 = vmul.f32 %v2107_v34, %v1850_v3  ;;  %v868_v4 = vmul.f32 %v2107_v34, %v1862_v17 }
  0x7e   : > { %v668_v35 = vadd.f32 %v636_v41, %v591_v63  ;;  %v669_v10 = vadd.f32 %v637_v7, %v592_v21  ;;  %v916_v20 = vperm.slane %v474_v43, 6  ;;  %v2131_v39 = vperm.slane %v474_v43, 7 }
  0x7f   : > { %v1064_v6 = vpack.c.bf16 %v1038_v55, %v1037_v49  ;;  %v573_v61 = vadd.f32 %v541_v26, %v496_v8  ;;  %v574_v48 = vadd.f32 %v542_v44, %v497_v56  ;;  %v696_v42 = vmul.f32 %v2055_v47, %v1956_v1 }
  0x80   : > { %v745_v0 = vadd.f32 %v713_v27, %v668_v35  ;;  %v746_v29 = vadd.f32 %v714_v9, %v669_v10  ;;  %v944_v41 = vmul.f32 %v916_v20, %v1864_v18  ;;  %v945_v7 = vmul.f32 %v916_v20, %v2653_v59 }
  0x81   : > { %1086 = vmatpush.bf16.msra.mxu0 %v1064_v6  ;;  %v1021_v63 = vmul.f32 %v2131_v39, %v2654_v58  ;;  %v1022_v55 = vmul.f32 %v2131_v39, %v2655_v53  ;;  %v650_v8 = vadd.f32 %v618_v52, %v573_v61  ;;  %v651_v27 = vadd.f32 %v619_v30, %v574_v48 }
  0x82   : > { %v822_v49 = vadd.f32 %v790_v54, %v745_v0  ;;  %v823_v43 = vadd.f32 %v791_v11, %v746_v29  ;;  %v772_v56 = vmul.f32 %v2057_v5, %v1958_v28  ;;  %v773_v47 = vmul.f32 %v2057_v5, %v1966_v40 }
  0x83   : > { %v849_v9 = vmul.f32 %v2059_v19, %v1972_v14  ;;  %v850_v26 = vmul.f32 %v2059_v19, %v1974_v15  ;;  %v727_v35 = vadd.f32 %v695_v13, %v650_v8  ;;  %v728_v10 = vadd.f32 %v696_v42, %v651_v27  ;;  %v2657_v13 = vld [vmem:[#allocation35_spill] sm:$0xff] }
  0x84   : > { %v899_v44 = vadd.f32 %v867_v12, %v822_v49  ;;  %v900_v21 = vadd.f32 %v868_v4, %v823_v43  ;;  %v926_v52 = vmul.f32 %v2079_v24, %v1976_v16  ;;  %v927_v30 = vmul.f32 %v2079_v24, %v1984_v23  ;;  %v2656_v12 = vld [vmem:[#allocation34_spill] sm:$0xff] }
  0x85   : > { %v1003_v54 = vmul.f32 %v2081_v33, %v1988_v25  ;;  %v1004_v5 = vmul.f32 %v2081_v33, %v1990_v62  ;;  %v804_v61 = vadd.f32 %v772_v56, %v727_v35  ;;  %v805_v19 = vadd.f32 %v773_v47, %v728_v10 }
  0x86   : > { %v976_v11 = vadd.f32 %v944_v41, %v899_v44  ;;  %v977_v6 = vadd.f32 %v945_v7, %v900_v21  ;;  %v512_v4 = vmul.f32 %v486_v57, %v2656_v12  ;;  %v513_v42 = vmul.f32 %v486_v57, %v1886_v31  ;;  %v2658_v7 = vld [vmem:[#allocation38_spill] sm:$0xff]  ;;  %v2659_v44 = vld [vmem:[#allocation39_spill] sm:$0xff] }
  0x87   : > { %v557_v0 = vmul.f32 %v2099_v36, %v2657_v13  ;;  %v558_v24 = vmul.f32 %v2099_v36, %v1898_v37  ;;  %v881_v49 = vadd.f32 %v849_v9, %v804_v61  ;;  %v882_v43 = vadd.f32 %v850_v26, %v805_v19 }
  0x88   : > { %v1053_v29 = vadd.f32 %v1021_v63, %v976_v11  ;;  %v1054_v48 = vadd.f32 %v1022_v55, %v977_v6  ;;  %v634_v41 = vmul.f32 %v2101_v45, %v1900_v38  ;;  %v635_v27 = vmul.f32 %v2101_v45, %v2658_v7 }
  0x89   : > { %v589_v8 = vadd.f32 %v557_v0, %v512_v4  ;;  %v590_v33 = vadd.f32 %v558_v24, %v513_v42  ;;  %v958_v57 = vadd.f32 %v926_v52, %v881_v49  ;;  %v959_v47 = vadd.f32 %v927_v30, %v882_v43  ;;  %v2660_v4 = vld [vmem:[#allocation20_spill] sm:$0xff]  ;;  %v2662_v24 = vld [vmem:[#allocation17_spill] sm:$0xff]  ;;  %v2665_v43 = vld [vmem:[#allocation19_spill] sm:$0xff] }
  0x8a   : > { %v1072_v56 = vpack.c.bf16 %v1054_v48, %v1053_v29  ;;  %v711_v21 = vmul.f32 %v2103_v2, %v2659_v44  ;;  %v712_v63 = vmul.f32 %v2103_v2, %v1956_v1  ;;  %v788_v55 = vmul.f32 %v2105_v32, %v1958_v28  ;;  %v2661_v42 = vld [vmem:[#allocation28_spill] sm:$0xff] }
  0x8b   : > { %v666_v35 = vadd.f32 %v634_v41, %v589_v8  ;;  %v667_v36 = vadd.f32 %v635_v27, %v590_v33  ;;  %v1035_v9 = vadd.f32 %v1003_v54, %v958_v57  ;;  %v1036_v26 = vadd.f32 %v1004_v5, %v959_v47 }
  0x8c   : > { %1099 = vmatpush.bf16.msra.mxu1 %v1072_v56  ;;  %v789_v45 = vmul.f32 %v2105_v32, %v1966_v40  ;;  %v865_v10 = vmul.f32 %v2107_v34, %v1972_v14  ;;  %v866_v11 = vmul.f32 %v2107_v34, %v1974_v15  ;;  %v942_v6 = vmul.f32 %v916_v20, %v1976_v16  ;;  %v2664_v34 = vld [vmem:[#allocation18_spill] sm:$0xff] }
  0x8d   : > { %v743_v52 = vadd.f32 %v711_v21, %v666_v35  ;;  %v744_v30 = vadd.f32 %v712_v63, %v667_v36  ;;  %v1063_v2 = vpack.c.bf16 %v1036_v26, %v1035_v9  ;;  %v943_v61 = vmul.f32 %v916_v20, %v1984_v23  ;;  %v2666_v20 = vld [vmem:[#allocation16_spill] sm:$0xff] }
  0x8e   : > { %v1019_v54 = vmul.f32 %v2131_v39, %v1988_v25  ;;  %v1020_v5 = vmul.f32 %v2131_v39, %v1990_v62  ;;  %v343_v0 = vmul.f32 %v2661_v42, %v2660_v4  ;;  %v2663_v29 = vrot.slane %v2662_v24, 1  ;;  %v2667_v39 = vld [vmem:[#allocation21_spill] sm:$0xff] }
  0x8f   : > { %v820_v32 = vadd.f32 %v788_v55, %v743_v52  ;;  %v821_v19 = vadd.f32 %v789_v45, %v744_v30  ;;  %1087 = vmatpush.bf16.msra.mxu0 %v1063_v2  ;;  %v395_v49 = vrot.slane %v2664_v34, 1  ;;  %v437_v8 = vrot.slane %v2665_v43, 1  ;;  %v2668_v52 = vld [vmem:[#allocation22_spill] sm:$0xff]  ;;  %v2669_v2 = vld [vmem:[#allocation23_spill] sm:$0xff] }
  0x90   : > { %v361_v48 = vperm.slane %v2663_v29, 0  ;;  %v323_v33 = vrot.slane %v2666_v20, 5  ;;  %v357_v41 = vrot.slane %v2662_v24, 5  ;;  %v399_v47 = vrot.slane %v2664_v34, 5 }
  0x91   : > { %v897_v27 = vadd.f32 %v865_v10, %v820_v32  ;;  %v898_v56 = vadd.f32 %v866_v11, %v821_v19  ;;  %v403_v21 = vperm.slane %v395_v49, 0  ;;  %v445_v35 = vperm.slane %v437_v8, 0 }
  0x92   : > { %v377_v57 = vmul.f32 %v361_v48, %v2667_v39  ;;  %v331_v36 = vperm.slane %v323_v33, 0  ;;  %v365_v63 = vperm.slane %v357_v41, 0  ;;  %v407_v45 = vperm.slane %v399_v47, 0 }
  0x93   : > { %v974_v55 = vadd.f32 %v942_v6, %v897_v27  ;;  %v975_v9 = vadd.f32 %v943_v61, %v898_v56  ;;  %v419_v30 = vmul.f32 %v403_v21, %v2668_v52  ;;  %v461_v42 = vmul.f32 %v445_v35, %v2669_v2 }
  0x94   : > { %v385_v26 = vadd.f32 %v377_v57, %v343_v0  ;;  %v347_v29 = vmul.f32 %v331_v36, %v2660_v4  ;;  %v381_v10 = vmul.f32 %v365_v63, %v2667_v39  ;;  %v423_v19 = vmul.f32 %v407_v45, %v2668_v52 }
  0x95   : > { %v1051_v11 = vadd.f32 %v1019_v54, %v974_v55  ;;  %v1052_v32 = vadd.f32 %v1020_v5, %v975_v9  ;;  %v441_v48 = vrot.slane %v2665_v43, 5  ;;  %v326_v6 = vperm.slane %v2666_v20, 0 }
  0x96   : > { %v427_v49 = vadd.f32 %v419_v30, %v385_v26  ;;  %v389_v8 = vadd.f32 %v381_v10, %v347_v29  ;;  %v360_v61 = vperm.slane %v2662_v24, 0 }
  0x97   : > { %v1071_v0 = vpack.c.bf16 %v1052_v32, %v1051_v11  ;;  %v449_v33 = vperm.slane %v441_v48, 0  ;;  %v2207_v5 = vmul.f32 %v326_v6, %v2660_v4  ;;  %v2672_v4 = vld [vmem:[#allocation24_spill] sm:$0xff]  ;;  %v2675_v32 = vld [vmem:[#allocation27_spill] sm:$0xff]  ;;  %v2676_v6 = vld [vmem:[#allocation29_spill] sm:$0xff] }
  0x98   : > { %v469_v41 = vadd.f32 %v461_v42, %v427_v49  ;;  %v431_v27 = vadd.f32 %v423_v19, %v389_v8  ;;  %v2210_v43 = vmul.f32 %v360_v61, %v2667_v39  ;;  %v2673_v39 = vld [vmem:[#allocation25_spill] sm:$0xff] }
  0x99   : > { %1100 = vmatpush.bf16.msra.mxu1 %v1071_v0  ;;  %v465_v54 = vmul.f32 %v449_v33, %v2669_v2  ;;  %2670 = vst [vmem:[#allocation30_spill] sm:$0xff] %v2207_v5  ;;  %v2674_v2 = vld [vmem:[#allocation26_spill] sm:$0xff] }
  0x9a   : > { %2671 = vst [vmem:[#allocation31_spill] sm:$0xff] %v2210_v43  ;;  %v481_v21 = vperm.slane %v469_v41, 0  ;;  %v526_v35 = vperm.slane %v469_v41, 1  ;;  %v2213_v36 = vperm.slane %v469_v41, 2  ;;  %v2215_v63 = vperm.slane %v469_v41, 3 }
  0x9b   : > { %v2217_v55 = vperm.slane %v469_v41, 4  ;;  %v2219_v9 = vperm.slane %v469_v41, 5  ;;  %v2221_v26 = vperm.slane %v469_v41, 6  ;;  %v2223_v45 = vperm.slane %v469_v41, 7 }
  0x9c   : > { %v494_v52 = vmul.f32 %v481_v21, %v2672_v4  ;;  %v495_v30 = vmul.f32 %v481_v21, %v2673_v39  ;;  %v539_v42 = vmul.f32 %v526_v35, %v2674_v2  ;;  %v540_v29 = vmul.f32 %v526_v35, %v1817_v46 }
  0x9d   : > { %v616_v10 = vmul.f32 %v2213_v36, %v1823_v50  ;;  %v617_v11 = vmul.f32 %v2213_v36, %v1825_v51  ;;  %v693_v19 = vmul.f32 %v2215_v63, %v2675_v32  ;;  %v694_v48 = vmul.f32 %v2215_v63, %v1840_v60 }
  0x9e   : > { %v571_v49 = vadd.f32 %v539_v42, %v494_v52  ;;  %v572_v8 = vadd.f32 %v540_v29, %v495_v30  ;;  %v770_v61 = vmul.f32 %v2217_v55, %v2676_v6  ;;  %v771_v0 = vmul.f32 %v2217_v55, %v2652_v22 }
  0x9f   : > { %v847_v33 = vmul.f32 %v2219_v9, %v1850_v3  ;;  %v848_v41 = vmul.f32 %v2219_v9, %v1862_v17  ;;  %v924_v47 = vmul.f32 %v2221_v26, %v1864_v18  ;;  %v925_v57 = vmul.f32 %v2221_v26, %v2653_v59 }
  0xa0   : > { %v648_v52 = vadd.f32 %v616_v10, %v571_v49  ;;  %v649_v30 = vadd.f32 %v617_v11, %v572_v8  ;;  %v1001_v42 = vmul.f32 %v2223_v45, %v2654_v58  ;;  %v1002_v29 = vmul.f32 %v2223_v45, %v2655_v53 }
  0xa1   : > { %v473_v56 = vadd.f32 %v465_v54, %v431_v27  ;;  %v492_v34 = vmul.f32 %v481_v21, %v2656_v12  ;;  %v493_v43 = vmul.f32 %v481_v21, %v1886_v31  ;;  %v537_v5 = vmul.f32 %v526_v35, %v2657_v13 }
  0xa2   : > { %v725_v24 = vadd.f32 %v693_v19, %v648_v52  ;;  %v726_v20 = vadd.f32 %v694_v48, %v649_v30  ;;  %v538_v62 = vmul.f32 %v526_v35, %v1898_v37  ;;  %v614_v10 = vmul.f32 %v2213_v36, %v1900_v38 }
  0xa3   : > { %v2259_v11 = vperm.slane %v473_v56, 0  ;;  %v2261_v49 = vperm.slane %v473_v56, 1  ;;  %v2263_v8 = vperm.slane %v473_v56, 2  ;;  %v2265_v27 = vperm.slane %v473_v56, 3 }
  0xa4   : > { %v802_v54 = vadd.f32 %v770_v61, %v725_v24  ;;  %v803_v12 = vadd.f32 %v771_v0, %v726_v20  ;;  %v2267_v21 = vperm.slane %v473_v56, 4  ;;  %v2269_v13 = vperm.slane %v473_v56, 5 }
  0xa5   : > { %v510_v35 = vmul.f32 %v2259_v11, %v2672_v4  ;;  %v511_v19 = vmul.f32 %v2259_v11, %v2673_v39  ;;  %v555_v48 = vmul.f32 %v2261_v49, %v2674_v2  ;;  %v556_v52 = vmul.f32 %v2261_v49, %v1817_v46 }
  0xa6   : > { %v879_v30 = vadd.f32 %v847_v33, %v802_v54  ;;  %v880_v38 = vadd.f32 %v848_v41, %v803_v12  ;;  %v632_v24 = vmul.f32 %v2263_v8, %v1823_v50  ;;  %v633_v20 = vmul.f32 %v2263_v8, %v1825_v51 }
  0xa7   : > { %v587_v61 = vadd.f32 %v555_v48, %v510_v35  ;;  %v588_v0 = vadd.f32 %v556_v52, %v511_v19  ;;  %v709_v4 = vmul.f32 %v2265_v27, %v2675_v32  ;;  %v710_v39 = vmul.f32 %v2265_v27, %v1840_v60 }
  0xa8   : > { %v956_v2 = vadd.f32 %v924_v47, %v879_v30  ;;  %v957_v37 = vadd.f32 %v925_v57, %v880_v38  ;;  %v786_v46 = vmul.f32 %v2267_v21, %v2676_v6  ;;  %v787_v12 = vmul.f32 %v2267_v21, %v2652_v22 }
  0xa9   : > { %v664_v50 = vadd.f32 %v632_v24, %v587_v61  ;;  %v665_v33 = vadd.f32 %v633_v20, %v588_v0  ;;  %v863_v51 = vmul.f32 %v2269_v13, %v1850_v3  ;;  %v864_v41 = vmul.f32 %v2269_v13, %v1862_v17  ;;  %v2677_v0 = vld [vmem:[#allocation40_spill] sm:$0xff] }
  0xaa   : > { %v1033_v32 = vadd.f32 %v1001_v42, %v956_v2  ;;  %v1034_v54 = vadd.f32 %v1002_v29, %v957_v37  ;;  %v2295_v35 = vperm.slane %v473_v56, 6  ;;  %v2297_v60 = vperm.slane %v473_v56, 7 }
  0xab   : > { %v741_v38 = vadd.f32 %v709_v4, %v664_v50  ;;  %v742_v57 = vadd.f32 %v710_v39, %v665_v33  ;;  %v569_v47 = vadd.f32 %v537_v5, %v492_v34  ;;  %v570_v6 = vadd.f32 %v538_v62, %v493_v43  ;;  %v2678_v39 = vld [vmem:[#allocation34_spill] sm:$0xff] }
  0xac   : > { %v1062_v19 = vpack.c.bf16 %v1034_v54, %v1033_v32  ;;  %v940_v22 = vmul.f32 %v2295_v35, %v1864_v18  ;;  %v941_v3 = vmul.f32 %v2295_v35, %v2653_v59  ;;  %v1017_v17 = vmul.f32 %v2297_v60, %v2654_v58  ;;  %v2681_v54 = vld [vmem:[#allocation37_spill] sm:$0xff] }
  0xad   : > { %v818_v42 = vadd.f32 %v786_v46, %v741_v38  ;;  %v819_v37 = vadd.f32 %v787_v12, %v742_v57  ;;  %v1018_v56 = vmul.f32 %v2297_v60, %v2655_v53  ;;  %v615_v29 = vmul.f32 %v2213_v36, %v2658_v7 }
  0xae   : > { %1088 = vmatpush.bf16.msra.mxu0 %v1062_v19  ;;  %v646_v62 = vadd.f32 %v614_v10, %v569_v47  ;;  %v691_v34 = vmul.f32 %v2215_v63, %v2659_v44  ;;  %v692_v18 = vmul.f32 %v2215_v63, %v1956_v1  ;;  %v768_v59 = vmul.f32 %v2217_v55, %v1958_v28 }
  0xaf   : > { %v895_v58 = vadd.f32 %v863_v51, %v818_v42  ;;  %v896_v5 = vadd.f32 %v864_v41, %v819_v37  ;;  %v647_v43 = vadd.f32 %v615_v29, %v570_v6  ;;  %v769_v53 = vmul.f32 %v2217_v55, %v1966_v40  ;;  %v2679_v51 = vld [vmem:[#allocation35_spill] sm:$0xff]  ;;  %v2680_v41 = vld [vmem:[#allocation36_spill] sm:$0xff] }
  0xb0   : > { %v723_v48 = vadd.f32 %v691_v34, %v646_v62  ;;  %v845_v36 = vmul.f32 %v2219_v9, %v1972_v14  ;;  %v846_v10 = vmul.f32 %v2219_v9, %v1974_v15  ;;  %v922_v52 = vmul.f32 %v2221_v26, %v1976_v16 }
  0xb1   : > { %v972_v63 = vadd.f32 %v940_v22, %v895_v58  ;;  %v973_v30 = vadd.f32 %v941_v3, %v896_v5  ;;  %v724_v24 = vadd.f32 %v692_v18, %v647_v43  ;;  %v923_v20 = vmul.f32 %v2221_v26, %v1984_v23 }
  0xb2   : > { %v800_v61 = vadd.f32 %v768_v59, %v723_v48  ;;  %v999_v55 = vmul.f32 %v2223_v45, %v1988_v25  ;;  %v1000_v4 = vmul.f32 %v2223_v45, %v2677_v0  ;;  %v508_v2 = vmul.f32 %v2259_v11, %v2678_v39  ;;  %v2687_v48 = vld [vmem:[#allocation31_spill] sm:$0xff]  ;;  %v1364_v39 = vld [vmem:[#allocation2 + $0x18] sm:$0xff] }
  0xb3   : > { %v1049_v9 = vadd.f32 %v1017_v17, %v972_v63  ;;  %v1050_v46 = vadd.f32 %v1018_v56, %v973_v30  ;;  %v801_v12 = vadd.f32 %v769_v53, %v724_v24  ;;  %v509_v50 = vmul.f32 %v2259_v11, %v1886_v31  ;;  %v2682_v17 = vld [vmem:[#allocation16_spill] sm:$0xff]  ;;  %v2684_v56 = vld [vmem:[#allocation17_spill] sm:$0xff]  ;;  %v2686_v53 = vld [vmem:[#allocation30_spill] sm:$0xff] }
  0xb4   : > { %v877_v33 = vadd.f32 %v845_v36, %v800_v61  ;;  %v553_v26 = vmul.f32 %v2261_v49, %v2679_v51  ;;  %v554_v32 = vmul.f32 %v2261_v49, %v2680_v41  ;;  %v630_v38 = vmul.f32 %v2263_v8, %v2681_v54  ;;  %v1360_v63 = vld [vmem:[%s1754_s13 + $0x18] sm:$0xff] }
  0xb5   : > { %v1070_v45 = vpack.c.bf16 %v1050_v46, %v1049_v9  ;;  %v878_v57 = vadd.f32 %v846_v10, %v801_v12  ;;  %v631_v47 = vmul.f32 %v2263_v8, %v2658_v7  ;;  %v707_v6 = vmul.f32 %v2265_v27, %v2659_v44  ;;  %v2688_v10 = vld [vmem:[#allocation18_spill] sm:$0xff] }
  0xb6   : > { %v954_v19 = vadd.f32 %v922_v52, %v877_v33  ;;  %v585_v31 = vadd.f32 %v553_v26, %v508_v2  ;;  %v586_v11 = vadd.f32 %v554_v32, %v509_v50  ;;  %v708_v22 = vmul.f32 %v2265_v27, %v1956_v1 }
  0xb7   : > { %1101 = vmatpush.bf16.msra.mxu1 %v1070_v45  ;;  %v955_v3 = vadd.f32 %v923_v20, %v878_v57  ;;  %v784_v49 = vmul.f32 %v2267_v21, %v1958_v28  ;;  %v2683_v42 = vrot.slane %v2682_v17, 4  ;;  %v2685_v29 = vrot.slane %v2684_v56, 4  ;;  %v1362_v20 = vld [vmem:[#allocation2 + $0x8] sm:$0xff] }
  0xb8   : > { %v1031_v62 = vadd.f32 %v999_v55, %v954_v19  ;;  %v662_v44 = vadd.f32 %v630_v38, %v585_v31  ;;  %v663_v34 = vadd.f32 %v631_v47, %v586_v11  ;;  %v785_v18 = vmul.f32 %v2267_v21, %v1966_v40  ;;  %v1359_v21 = vld [vmem:[#allocation2 + $0x10] sm:$0xff] }
  0xb9   : > { %v330_v37 = vperm.slane %v2683_v42, 0  ;;  %v364_v8 = vperm.slane %v2685_v29, 0  ;;  %v1032_v59 = vadd.f32 %v1000_v4, %v955_v3  ;;  %v861_v1 = vmul.f32 %v2269_v13, %v1972_v14  ;;  %v1363_v55 = vld [vmem:[%s1754_s13 + $0x10] sm:$0xff]  ;;  %v2388_v42 = vld [vmem:[#allocation7 + $0x38] sm:$0xff] }
  0xba   : > { %v862_v28 = vmul.f32 %v2269_v13, %v1974_v15  ;;  %v938_v27 = vmul.f32 %v2295_v35, %v1976_v16  ;;  %v739_v58 = vadd.f32 %v707_v6, %v662_v44  ;;  %v740_v5 = vadd.f32 %v708_v22, %v663_v34  ;;  %v1361_v15 = vld [vmem:[#allocation2] sm:$0xff]  ;;  %v2382_v22 = vld [vmem:[#allocation7 + $0x18] sm:$0xff]  ;;  %v2391_v29 = vld [vmem:[#allocation7 + $0x50] sm:$0xff] }
  0xbb   : > { %v939_v43 = vmul.f32 %v2295_v35, %v1984_v23  ;;  %v384_v36 = vadd.f32 %v2687_v48, %v2686_v53  ;;  %v1061_v40 = vpack.c.bf16 %v1032_v59, %v1031_v62  ;;  %v2689_v52 = vperm.slane %v2688_v10, 0  ;;  %v2395_v62 = vld [vmem:[#allocation7 + $0x58] sm:$0xff]  ;;  %v2399_v34 = vld [vmem:[#allocation7 + $0x70] sm:$0xff] }
  0xbc   : > { %v444_v30 = vperm.slane %v1360_v63, 0  ;;  %v346_v13 = vmul.f32 %v1361_v15, %v330_v37  ;;  %v816_v24 = vadd.f32 %v784_v49, %v739_v58  ;;  %v817_v16 = vadd.f32 %v785_v18, %v740_v5  ;;  %v2385_v49 = vld [vmem:[#allocation7 + $0x30] sm:$0xff] }
  0xbd   : > { %v418_v14 = vmul.f32 %v1359_v21, %v2689_v52  ;;  %v380_v61 = vmul.f32 %v1362_v20, %v364_v8  ;;  %v398_v4 = vrot.slane %v1363_v55, 4  ;;  %1089 = vmatpush.bf16.msra.mxu0 %v1061_v40  ;;  %v1015_v23 = vmul.f32 %v2297_v60, %v1988_v25  ;;  %v2404_v58 = vld [vmem:[#allocation7 + $0x90] sm:$0xff]  ;;  %v1376_v40 = vld [vmem:[#allocation7 + $0xb8] sm:$0xff]  ;;  %v1075_v52 = vld [vmem:[%s1764_s7] sm:$0xf] }
  0xbe   : > { %v460_v2 = vmul.f32 %v1364_v39, %v444_v30  ;;  %v440_v9 = vrot.slane %v1360_v63, 4  ;;  %v893_v46 = vadd.f32 %v861_v1, %v816_v24  ;;  %v894_v12 = vadd.f32 %v862_v28, %v817_v16  ;;  %v1372_v28 = vld [vmem:[#allocation7 + $0x78] sm:$0xff]  ;;  %v1375_v48 = vld [vmem:[#allocation7 + $0xb0] sm:$0xff]  ;;  %1077 = vst [vmem:[#allocation1] ss:$4 sm:$0xff] %v1075_v52  ;;  %v2421_v55 = vld [vmem:[#allocation7] sm:$0xff] }
  0xbf   : > { %v426_v35 = vadd.f32 %v418_v14, %v384_v36  ;;  %v1016_v50 = vmul.f32 %v2297_v60, %v2677_v0  ;;  %v406_v33 = vperm.slane %v398_v4, 0  ;;  %v388_v26 = vadd.f32 %v380_v61, %v346_v13  ;;  %v2379_v60 = vld [vmem:[#allocation7 + $0x10] sm:$0xff]  ;;  %v1378_v16 = vld [vmem:[#allocation7 + $0xd8] sm:$0xff] }
  0xc0   : > { %v970_v41 = vadd.f32 %v938_v27, %v893_v46  ;;  %v971_v32 = vadd.f32 %v939_v43, %v894_v12  ;;  %v448_v38 = vperm.slane %v440_v9, 0  ;;  %v1374_v43 = vld [vmem:[#allocation7 + $0x98] sm:$0xff]  ;;  %v2416_v13 = vld [vmem:[#allocation7 + $0xd0] sm:$0xff] }
  0xc1   : > { %v468_v51 = vadd.f32 %v460_v2, %v426_v35  ;;  %v422_v54 = vmul.f32 %v1359_v21, %v406_v33  ;;  %v1380_v2 = vld [vmem:[#allocation7 + $0xf0] sm:$0xff]  ;;  %v1381_v46 = vld [vmem:[#allocation7 + $0xf8] sm:$0xff]  ;;  %v2426_v33 = vld [vmem:[#allocation7 + $0x8] sm:$0xff] }
  0xc2   : > { %v1047_v6 = vadd.f32 %v1015_v23, %v970_v41  ;;  %v1048_v19 = vadd.f32 %v1016_v50, %v971_v32  ;;  %v464_v61 = vmul.f32 %v1364_v39, %v448_v38  ;;  %v2432_v41 = vld [vmem:[#allocation7 + $0x28] sm:$0xff] }
  0xc3   : > { %v480_v45 = vperm.slane %v468_v51, 0  ;;  %v525_v57 = vperm.slane %v468_v51, 1  ;;  %v2371_v47 = vperm.slane %v468_v51, 2  ;;  %v2373_v25 = vperm.slane %v468_v51, 3 }
  0xc4   : > { %v2375_v31 = vperm.slane %v468_v51, 4  ;;  %v2377_v11 = vperm.slane %v468_v51, 5  ;;  %v1069_v56 = vpack.c.bf16 %v1048_v19, %v1047_v6  ;;  %v2411_v10 = vperm.slane %v468_v51, 6  ;;  %v2435_v6 = vld [vmem:[#allocation7 + $0x40] sm:$0xff] }
  0xc5   : > { %v490_v0 = vmul.f32 %v2379_v60, %v480_v45  ;;  %v491_v3 = vmul.f32 %v2382_v22, %v480_v45  ;;  %v535_v17 = vmul.f32 %v2385_v49, %v525_v57  ;;  %v536_v37 = vmul.f32 %v2388_v42, %v525_v57 }
  0xc6   : > { %v612_v8 = vmul.f32 %v2391_v29, %v2371_v47  ;;  %v613_v44 = vmul.f32 %v2395_v62, %v2371_v47  ;;  %v689_v18 = vmul.f32 %v2399_v34, %v2373_v25  ;;  %v690_v27 = vmul.f32 %v1372_v28, %v2373_v25  ;;  %1102 = vmatpush.bf16.msra.mxu1 %v1069_v56 }
  0xc7   : > { %v567_v59 = vadd.f32 %v535_v17, %v490_v0  ;;  %v568_v1 = vadd.f32 %v536_v37, %v491_v3  ;;  %v766_v5 = vmul.f32 %v2404_v58, %v2375_v31  ;;  %v767_v53 = vmul.f32 %v1374_v43, %v2375_v31 }
  0xc8   : > { %v843_v36 = vmul.f32 %v1375_v48, %v2377_v11  ;;  %v844_v21 = vmul.f32 %v1376_v40, %v2377_v11  ;;  %v2414_v30 = vperm.slane %v468_v51, 7  ;;  %v430_v15 = vadd.f32 %v422_v54, %v388_v26  ;;  %v2429_v26 = vld [vmem:[#allocation7 + $0x20] sm:$0xff] }
  0xc9   : > { %v644_v14 = vadd.f32 %v612_v8, %v567_v59  ;;  %v645_v63 = vadd.f32 %v613_v44, %v568_v1  ;;  %v920_v24 = vmul.f32 %v2416_v13, %v2411_v10  ;;  %v921_v20 = vmul.f32 %v1378_v16, %v2411_v10 }
  0xca   : > { %v488_v4 = vmul.f32 %v2421_v55, %v480_v45  ;;  %v997_v9 = vmul.f32 %v1380_v2, %v2414_v30  ;;  %v998_v12 = vmul.f32 %v1381_v46, %v2414_v30  ;;  %v472_v50 = vadd.f32 %v464_v61, %v430_v15 }
  0xcb   : > { %v721_v23 = vadd.f32 %v689_v18, %v644_v14  ;;  %v722_v35 = vadd.f32 %v690_v27, %v645_v63  ;;  %v489_v51 = vmul.f32 %v2426_v33, %v480_v45  ;;  %v533_v39 = vmul.f32 %v2429_v26, %v525_v57 }
  0xcc   : > { %v534_v32 = vmul.f32 %v2432_v41, %v525_v57  ;;  %v610_v19 = vmul.f32 %v2435_v6, %v2371_v47  ;;  %v611_v0 = vmul.f32 %v2371_v47, %v2658_v7  ;;  %v2441_v3 = vperm.slane %v472_v50, 0 }
  0xcd   : > { %v798_v54 = vadd.f32 %v766_v5, %v721_v23  ;;  %v799_v38 = vadd.f32 %v767_v53, %v722_v35  ;;  %v2443_v45 = vperm.slane %v472_v50, 1  ;;  %v2445_v17 = vperm.slane %v472_v50, 2 }
  0xce   : > { %v2447_v37 = vperm.slane %v472_v50, 3  ;;  %v2449_v8 = vperm.slane %v472_v50, 4  ;;  %v2451_v44 = vperm.slane %v472_v50, 5  ;;  %v506_v18 = vmul.f32 %v2379_v60, %v2441_v3 }
  0xcf   : > { %v875_v56 = vadd.f32 %v843_v36, %v798_v54  ;;  %v876_v57 = vadd.f32 %v844_v21, %v799_v38  ;;  %v507_v7 = vmul.f32 %v2382_v22, %v2441_v3  ;;  %v551_v47 = vmul.f32 %v2385_v49, %v2443_v45 }
  0xd0   : > { %v552_v59 = vmul.f32 %v2388_v42, %v2443_v45  ;;  %v628_v5 = vmul.f32 %v2391_v29, %v2445_v17  ;;  %v629_v53 = vmul.f32 %v2395_v62, %v2445_v17  ;;  %v705_v60 = vmul.f32 %v2399_v34, %v2447_v37 }
  0xd1   : > { %v952_v1 = vadd.f32 %v920_v24, %v875_v56  ;;  %v953_v27 = vadd.f32 %v921_v20, %v876_v57  ;;  %v583_v36 = vadd.f32 %v551_v47, %v506_v18  ;;  %v706_v22 = vmul.f32 %v1372_v28, %v2447_v37  ;;  %v1389_v57 = vld [vmem:[#allocation7 + $0x88] sm:$0xff] }
  0xd2   : > { %v584_v21 = vadd.f32 %v552_v59, %v507_v7  ;;  %v782_v42 = vmul.f32 %v2404_v58, %v2449_v8  ;;  %v783_v14 = vmul.f32 %v1374_v43, %v2449_v8  ;;  %v859_v29 = vmul.f32 %v1375_v48, %v2451_v44 }
  0xd3   : > { %v1029_v52 = vadd.f32 %v997_v9, %v952_v1  ;;  %v1030_v49 = vadd.f32 %v998_v12, %v953_v27  ;;  %v660_v63 = vadd.f32 %v628_v5, %v583_v36  ;;  %v860_v62 = vmul.f32 %v1376_v40, %v2451_v44  ;;  %v1386_v9 = vld [vmem:[#allocation7 + $0x60] sm:$0xff] }
  0xd4   : > { %v661_v15 = vadd.f32 %v629_v53, %v584_v21  ;;  %v2473_v20 = vperm.slane %v472_v50, 6  ;;  %v2475_v61 = vperm.slane %v472_v50, 7  ;;  %v565_v34 = vadd.f32 %v533_v39, %v488_v4  ;;  %v1387_v39 = vld [vmem:[#allocation7 + $0x68] sm:$0xff]  ;;  %v1394_v5 = vld [vmem:[#allocation7 + $0xe0] sm:$0xff] }
  0xd5   : > { %v1060_v24 = vpack.c.bf16 %v1030_v49, %v1029_v52  ;;  %v737_v28 = vadd.f32 %v705_v60, %v660_v63  ;;  %v566_v35 = vadd.f32 %v534_v32, %v489_v51  ;;  %v687_v58 = vmul.f32 %v1386_v9, %v2373_v25  ;;  %v1388_v32 = vld [vmem:[#allocation7 + $0x80] sm:$0xff]  ;;  %v1395_v60 = vld [vmem:[#allocation7 + $0xe8] sm:$0xff] }
  0xd6   : > { %v738_v23 = vadd.f32 %v706_v22, %v661_v15  ;;  %v936_v43 = vmul.f32 %v2416_v13, %v2473_v20  ;;  %v937_v48 = vmul.f32 %v1378_v16, %v2473_v20  ;;  %v1013_v40 = vmul.f32 %v1380_v2, %v2475_v61  ;;  %v1390_v13 = vld [vmem:[#allocation7 + $0xa0] sm:$0xff] }
  0xd7   : > { %1090 = vmatpush.bf16.msra.mxu0 %v1060_v24  ;;  %v1014_v12 = vmul.f32 %v1381_v46, %v2475_v61  ;;  %v814_v54 = vadd.f32 %v782_v42, %v737_v28  ;;  %v642_v38 = vadd.f32 %v610_v19, %v565_v34  ;;  %v643_v4 = vadd.f32 %v611_v0, %v566_v35  ;;  %v1391_v46 = vld [vmem:[#allocation7 + $0xa8] sm:$0xff]  ;;  %v1392_v0 = vld [vmem:[#allocation7 + $0xc0] sm:$0xff] }
  0xd8   : > { %v815_v50 = vadd.f32 %v783_v14, %v738_v23  ;;  %v688_v51 = vmul.f32 %v1387_v39, %v2373_v25  ;;  %v764_v56 = vmul.f32 %v1388_v32, %v2375_v31  ;;  %v765_v18 = vmul.f32 %v1389_v57, %v2375_v31  ;;  %v1393_v25 = vld [vmem:[#allocation7 + $0xc8] sm:$0xff] }
  0xd9   : > { %v841_v16 = vmul.f32 %v1390_v13, %v2377_v11  ;;  %v891_v7 = vadd.f32 %v859_v29, %v814_v54  ;;  %v719_v47 = vadd.f32 %v687_v58, %v642_v38  ;;  %v842_v59 = vmul.f32 %v1391_v46, %v2377_v11  ;;  %v1396_v24 = vld [vmem:[#allocation7 + $0x48] sm:$0xff] }
  0xda   : > { %v892_v2 = vadd.f32 %v860_v62, %v815_v50  ;;  %v720_v19 = vadd.f32 %v688_v51, %v643_v4  ;;  %v918_v1 = vmul.f32 %v1392_v0, %v2411_v10  ;;  %v919_v27 = vmul.f32 %v1393_v25, %v2411_v10 }
  0xdb   : > { %v995_v53 = vmul.f32 %v1394_v5, %v2414_v30  ;;  %v968_v31 = vadd.f32 %v936_v43, %v891_v7  ;;  %v796_v21 = vadd.f32 %v764_v56, %v719_v47  ;;  %v996_v22 = vmul.f32 %v1395_v60, %v2414_v30 }
  0xdc   : > { %v969_v36 = vadd.f32 %v937_v48, %v892_v2  ;;  %v797_v52 = vadd.f32 %v765_v18, %v720_v19  ;;  %v504_v11 = vmul.f32 %v2421_v55, %v2441_v3  ;;  %v505_v49 = vmul.f32 %v2426_v33, %v2441_v3 }
  0xdd   : > { %v549_v42 = vmul.f32 %v2429_v26, %v2443_v45  ;;  %v1045_v10 = vadd.f32 %v1013_v40, %v968_v31  ;;  %v873_v63 = vadd.f32 %v841_v16, %v796_v21  ;;  %v550_v15 = vmul.f32 %v2432_v41, %v2443_v45  ;;  %v1078_v40 = vld.sshfl [vmem:[#allocation1] sm:$0xff pattern:$0x73625140]  ;;  %v1079_v16 = vld.sshfl [vmem:[#allocation1 + $0x8] sm:$0xff pattern:$0x73625140] }
  0xde   : > { %v1046_v14 = vadd.f32 %v1014_v12, %v969_v36  ;;  %v874_v29 = vadd.f32 %v842_v59, %v797_v52  ;;  %v626_v30 = vmul.f32 %v2435_v6, %v2445_v17  ;;  %v627_v55 = vmul.f32 %v1396_v24, %v2445_v17 }
  0xdf   : > { %v581_v62 = vadd.f32 %v549_v42, %v504_v11  ;;  %v950_v28 = vadd.f32 %v918_v1, %v873_v63  ;;  %v582_v33 = vadd.f32 %v550_v15, %v505_v49  ;;  %v703_v3 = vmul.f32 %v1386_v9, %v2447_v37 }
  0xe0   : > { %v1068_v34 = vpack.c.bf16 %v1046_v14, %v1045_v10  ;;  %v951_v26 = vadd.f32 %v919_v27, %v874_v29  ;;  %v704_v35 = vmul.f32 %v1387_v39, %v2447_v37  ;;  %v780_v58 = vmul.f32 %v1388_v32, %v2449_v8 }
  0xe1   : > { %v658_v23 = vadd.f32 %v626_v30, %v581_v62  ;;  %v1027_v41 = vadd.f32 %v995_v53, %v950_v28  ;;  %v659_v45 = vadd.f32 %v627_v55, %v582_v33  ;;  %v781_v43 = vmul.f32 %v1389_v57, %v2449_v8 }
  0xe2   : > { %1103 = vmatpush.bf16.msra.mxu1 %v1068_v34  ;;  %v1028_v6 = vadd.f32 %v996_v22, %v951_v26  ;;  %v857_v17 = vmul.f32 %v1390_v13, %v2451_v44  ;;  %v858_v54 = vmul.f32 %v1391_v46, %v2451_v44  ;;  %v934_v38 = vmul.f32 %v1392_v0, %v2473_v20 }
  0xe3   : > { %v735_v48 = vadd.f32 %v703_v3, %v658_v23  ;;  %v736_v12 = vadd.f32 %v704_v35, %v659_v45  ;;  %v935_v4 = vmul.f32 %v1393_v25, %v2473_v20  ;;  %v1082_v39 = vpack.c.bf16 %v1078_v40, %v1078_v40 }
  0xe4   : > { %v1059_v9 = vpack.c.bf16 %v1028_v6, %v1027_v41  ;;  %v1011_v8 = vmul.f32 %v1394_v5, %v2475_v61  ;;  %v1012_v56 = vmul.f32 %v1395_v60, %v2475_v61  ;;  %v1083_v2 = vpack.c.bf16 %v1079_v16, %v1079_v16 }
  0xe5   : > { %v812_v50 = vadd.f32 %v780_v58, %v735_v48  ;;  %v813_v37 = vadd.f32 %v781_v43, %v736_v12 }
  0xe6   : > { %1091 = vmatpush.bf16.msra.mxu0 %v1059_v9 }
  0xe7   : > { %v889_v51 = vadd.f32 %v857_v17, %v812_v50  ;;  %v890_v32 = vadd.f32 %v858_v54, %v813_v37 }
  0xe9   : > { %v966_v57 = vadd.f32 %v934_v38, %v889_v51  ;;  %v967_v18 = vadd.f32 %v935_v4, %v890_v32  ;;  %1092 = vmatmul.bf16.vlgmr.msra.gmra.mxu0 %v1082_v39 }
  0xeb   : > { %v1043_v13 = vadd.f32 %v1011_v8, %v966_v57  ;;  %v1044_v44 = vadd.f32 %v1012_v56, %v967_v18 }
  0xed   : > { %v1067_v7 = vpack.c.bf16 %v1044_v44, %v1043_v13 }
  0xef   : > { %1104 = vmatpush.bf16.msra.mxu1 %v1067_v7 }
  0xf2   : > { %1105 = vmatmul.bf16.vlgmr.msra.gmra.mxu1 %v1083_v2 }
 0x166   : > { %v1093_v47 = vpop.f32.mrf.mxu0 }
 0x16e   : > { %v1095_v20 = vpop.f32.mrf.mxu0 }
 0x16f   : > { %v1106_v46 = vpop.f32.mrf.mxu1 }
 0x170   : > { %v1107_v59 = vadd.f32 %v1106_v46, %v1093_v47 }
 0x173   : > { %1113 = sbr.rel (%p1261_p1) target bundleno = 377 (0x179), region = 56 }
 0x177   : > { %v1108_v19 = vpop.f32.mrf.mxu1 }
 0x178   : > { %1114 = vst [vmem:[#allocation10] sm:$0x3] %v1107_v59 }
 0x179 PF: > { %p1262_p2 = scmp.le.s32.totalorder %s1603_s18, 0 }
 0x17b   : > { %1118 = sbr.rel (%p1262_p2) target bundleno = 388 (0x184), region = 60 }
 0x180   : > { %v1119_v61 = vld [vmem:[#allocation10] sm:$0x3] }
 0x181   : > { %v1120_v0 = vadd.f32 %v1119_v61, %v1107_v59 }
 0x183   : > { %1121 = vst [vmem:[#allocation10] sm:$0x3] %v1120_v0 }
 0x184 PF: > { %p1303_p3 = scmp.eq.s32.totalorder %s1673_s21, 1  ;;  %s1132_s8 = sshll.u32 %s2541_s4, 4  ;;  %s1133_s8 = int_to_ptr.hbm [resolvable:$true] %s1132_s8 }
 0x185   : > { %s1618_s9 = smov [#allocation10]  }
 0x186   : > { %s1130_s10 = sshll.u32 %s1618_s9, 4  ;;  %s1131_s10 = int_to_ptr.vmem [resolvable:$true] %s1130_s10 }
 0x187   : > { %1281 = dma.vmem_to_hbm [thread:$0]  (%p1303_p3), %s1131_s10, 32, %s1133_s8, [#allocation4]  }
 0x188   : > { %1586 = dma.done.wait (%p1303_p3), [#allocation4], 32  }
 0x189   : > { %1588 = vsyncadd (%p1303_p3), [#allocation4], 4294967264 }
 0x18a PF: > { %s22_s20 = sadd.s32 1, %s1611_s20   ;;  %s2690_s15 = smov %s1595_s16 }
 0x18b   : > { %p19_p4 = scmp.ge.s32.totalorder %s22_s20, 4   ;;  %s2691_s16 = smov %s1599_s17 }
 0x18c   : > { %s2692_s17 = smov %s1734_s11  ;;  %s2693_s18 = smov %s1607_s19 }
 0x18d   : > { %s2694_s19 = smov %s2696_s14  ;;  %21 = sbr.rel (!%p19_p4) target bundleno = 12 (0xc), region = 116 }
 0x192   :  { %1146 = vsyncpa [#allocation3], 1 }
 0x193   :  { %1148 = vsyncpa [#allocation3 + $0x1], 1 }
 0x194   :  { %1149 = vsyncpa [#allocation6], 1 }
 0x195   :  { %1151 = vsyncpa [#allocation6 + $0x1], 1 }
 0x196   :  { %1152 = vsyncpa [#allocation9], 1 }
 0x197   :  { %1154 = vsyncpa [#allocation9 + $0x1], 1 }
 0x198   :  { %1155 = vsyncpa [#allocation4], 1 }
 0x199   :  { %1157 = vsyncpa [#allocation4 + $0x1], 1 }

</bundles_post_ra>
